<compile_context>
chip_gen: v7x
topology: tpu7x:2x2x1
jax: 0.10.0
libtpu: 0.0.40
codegen_flags: <defaults>
</compile_context>

<pallas_src>
import math
import jax
import jax.numpy as jnp
from jax.experimental import pallas as pl
from jax.experimental.pallas import tpu as pltpu

# ---- scaled-down roberta-base config ----------------------------------------
VOCAB = 100
MAX_POS = 64
TYPE_VOCAB = 1
HIDDEN = 32
N_HEADS = 2
HEAD_DIM = HIDDEN // N_HEADS
FFN = 4 * HIDDEN
N_LAYERS = 2
N_CLASSES = 3
PAD_IDX = 1
LN_EPS = 1e-5
B = 2
S = 8
OUT_PAD = 128           # lane-dense padded width for the fused classifier heads


# ---- in-kernel helpers -------------------------------------------------------
def _layernorm(x, g, b):
    mu = jnp.mean(x, axis=-1, keepdims=True)
    var = jnp.mean((x - mu) ** 2, axis=-1, keepdims=True)
    return (x - mu) * jax.lax.rsqrt(var + LN_EPS) * g + b


def _gelu(x):
    # TODO(synk): roberta-base uses exact erf-GELU; tanh approximation kept for
    # guaranteed Mosaic lowering (numerically very close).
    c = math.sqrt(2.0 / math.pi)
    return 0.5 * x * (1.0 + jnp.tanh(c * (x + 0.044715 * x * x * x)))


def _mm(a_bf16, w_bf16):
    # bf16 operands -> MXU-native on v6e/v7x, f32 accumulation everywhere.
    return jnp.dot(a_bf16, w_bf16, preferred_element_type=jnp.float32)


# ---- fused kernel (grid-less: everything in one invocation) -------------------
def fused_roberta_kernel(emb_ref, mask_ref, embg_ref, embb_ref,
                         wqkv_ref, bqkv_ref, wo_ref, bo_ref,
                         ln1g_ref, ln1b_ref, w1_ref, b1_ref,
                         w2_ref, b2_ref, ln2g_ref, ln2b_ref,
                         wp_ref, bp_ref, wh_ref, bh_ref,
                         logits_ref, x_scr):
    # Embedding LayerNorm -> flat (B*S, H) hidden state (no (B,S,H) relayouts).
    x = _layernorm(emb_ref[...], embg_ref[...], embb_ref[...])
    mask2d = mask_ref[...]                      # (B*S, B*S) additive mask
    scale = 1.0 / math.sqrt(HEAD_DIM)

    for l in range(N_LAYERS):                   # static unroll over layers
        # ---- self-attention (all 2-D matmuls) --------------------------------
        xb = x.astype(jnp.bfloat16)             # cast once per matmul chain
        qkv = _mm(xb, wqkv_ref[l]) + bqkv_ref[l]            # (B*S, 3H) fused Q|K|V

        ctx_heads = []
        for h in range(N_HEADS):                # static unroll over heads
            qlo = h * HEAD_DIM
            klo = HIDDEN + h * HEAD_DIM
            vlo = 2 * HIDDEN + h * HEAD_DIM
            qh = qkv[:, qlo:qlo + HEAD_DIM].astype(jnp.bfloat16)
            kh = qkv[:, klo:klo + HEAD_DIM].astype(jnp.bfloat16)
            vh = qkv[:, vlo:vlo + HEAD_DIM].astype(jnp.bfloat16)

            s = _mm(qh, kh.T) * scale + mask2d               # (B*S, B*S) flat scores
            m = jnp.max(s, axis=-1, keepdims=True)
            e = jnp.exp(s - m)
            p = e * pl.reciprocal(jnp.sum(e, axis=-1, keepdims=True), approx=True)
            ctx_heads.append(_mm(p.astype(jnp.bfloat16), vh))  # (B*S, HEAD_DIM)

        ctx = jnp.concatenate(ctx_heads, axis=-1)            # (B*S, H) contiguous
        attn = _mm(ctx.astype(jnp.bfloat16), wo_ref[l]) + bo_ref[l]   # one W_o matmul

        x1 = _layernorm(x + attn, ln1g_ref[l], ln1b_ref[l])

        # ---- feed-forward -----------------------------------------------------
        hmid = _gelu(_mm(x1.astype(jnp.bfloat16), w1_ref[l]) + b1_ref[l])
        ffn = _mm(hmid.astype(jnp.bfloat16), w2_ref[l]) + b2_ref[l]
        x = _layernorm(x1 + ffn, ln2g_ref[l], ln2b_ref[l])

    # ---- pooler + fused (fc_out | binary_transform) heads --------------------
    x_scr[...] = x
    cls = x_scr[pl.ds(0, B, stride=S), :]       # one strided sublane load of CLS rows
    pooled = jnp.tanh(_mm(cls.astype(jnp.bfloat16), wp_ref[...]) + bp_ref[...])
    # nn.Dropout(p=0.5) is identity in eval mode.
    logits_ref[...] = _mm(pooled.astype(jnp.bfloat16), wh_ref[...]) + bh_ref[...]


# ---- parameter init (deterministic, synthetic) --------------------------------
def init_params(key):
    keys = iter(jax.random.split(key, 64))
    bf = jnp.bfloat16

    def nrm(shape, dtype=jnp.float32):
        return (0.02 * jax.random.normal(next(keys), shape)).astype(dtype)

    p = {
        'word_emb': nrm((VOCAB, HIDDEN)),
        'pos_emb': nrm((MAX_POS, HIDDEN)),
        'type_emb': nrm((TYPE_VOCAB, HIDDEN)),
        'emb_ln_g': jnp.ones((1, HIDDEN), jnp.float32),
        'emb_ln_b': jnp.zeros((1, HIDDEN), jnp.float32),
        # stacked per-layer weights (leading layer dim); matmul weights bf16
        'wqkv': nrm((N_LAYERS, HIDDEN, 3 * HIDDEN), bf),   # Wq|Wk|Wv fused
        'bqkv': nrm((N_LAYERS, 1, 3 * HIDDEN)),
        'wo':   nrm((N_LAYERS, HIDDEN, HIDDEN), bf),
        'bo':   nrm((N_LAYERS, 1, HIDDEN)),
        'ln1g': jnp.ones((N_LAYERS, 1, HIDDEN), jnp.float32),
        'ln1b': jnp.zeros((N_LAYERS, 1, HIDDEN), jnp.float32),
        'w1':   nrm((N_LAYERS, HIDDEN, FFN), bf),
        'b1':   nrm((N_LAYERS, 1, FFN)),
        'w2':   nrm((N_LAYERS, FFN, HIDDEN), bf),
        'b2':   nrm((N_LAYERS, 1, HIDDEN)),
        'ln2g': jnp.ones((N_LAYERS, 1, HIDDEN), jnp.float32),
        'ln2b': jnp.zeros((N_LAYERS, 1, HIDDEN), jnp.float32),
        # pooler
        'wp': nrm((HIDDEN, HIDDEN), bf),
        'bp': nrm((1, HIDDEN)),
    }
    # fc_out (N_CLASSES) and binary_transform (2) fused + lane-padded to 128.
    wfc = nrm((HIDDEN, N_CLASSES)); bfc = nrm((1, N_CLASSES))
    wbt = nrm((HIDDEN, 2));         bbt = nrm((1, 2))
    wheads = jnp.zeros((HIDDEN, OUT_PAD), jnp.float32)
    wheads = wheads.at[:, :N_CLASSES].set(wfc)
    wheads = wheads.at[:, N_CLASSES:N_CLASSES + 2].set(wbt)
    bheads = jnp.zeros((1, OUT_PAD), jnp.float32)
    bheads = bheads.at[:, :N_CLASSES].set(bfc)
    bheads = bheads.at[:, N_CLASSES:N_CLASSES + 2].set(bbt)
    p['wheads'] = wheads.astype(bf)
    p['bheads'] = bheads
    return p


# ---- forward (wrapper glue + single grid-less pallas_call) ---------------------
def roberta_classifier_forward(params, input_ids, attention_mask):
    # RoBERTa-style position ids (offset by padding_idx).
    not_pad = (input_ids != PAD_IDX).astype(jnp.int32)
    position_ids = jnp.cumsum(not_pad, axis=1) * not_pad + PAD_IDX

    # Embedding gathers stay in JAX (glue); everything else is one Pallas kernel.
    # TODO(synk): at real shapes, gather in-kernel via scalar-prefetched ids.
    emb = (jnp.take(params['word_emb'], input_ids, axis=0)
           + jnp.take(params['pos_emb'], position_ids, axis=0)
           + params['type_emb'][0][None, None, :]).astype(jnp.float32)
    emb_flat = emb.reshape(B * S, HIDDEN)

    # Precomputed (B*S, B*S) additive mask: blocks cross-batch attention and
    # masked (padding) keys in one shot -> flat 2-D attention inside the kernel.
    batch_idx = jnp.arange(B * S, dtype=jnp.int32) // S
    same_batch = batch_idx[:, None] == batch_idx[None, :]
    key_valid = attention_mask.reshape(B * S) > 0
    mask2d = jnp.where(same_batch & key_valid[None, :], 0.0, -1e9).astype(jnp.float32)

    vmem = lambda: pl.BlockSpec(memory_space=pltpu.MemorySpace.VMEM)

    logits = pl.pallas_call(
        fused_roberta_kernel,
        out_shape=jax.ShapeDtypeStruct((B, OUT_PAD), jnp.float32),
        in_specs=[vmem() for _ in range(20)],
        out_specs=vmem(),
        scratch_shapes=[pltpu.VMEM((B * S, HIDDEN), jnp.float32)],
    )(emb_flat, mask2d, params['emb_ln_g'], params['emb_ln_b'],
      params['wqkv'], params['bqkv'], params['wo'], params['bo'],
      params['ln1g'], params['ln1b'], params['w1'], params['b1'],
      params['w2'], params['b2'], params['ln2g'], params['ln2b'],
      params['wp'], params['bp'], params['wheads'], params['bheads'])

    output = logits[:, :N_CLASSES]
    binary_output = logits[:, N_CLASSES:N_CLASSES + 2]
    return output, binary_output


# ---- main ---------------------------------------------------------------------
if __name__ == "__main__":
    root = jax.random.PRNGKey(0)
    k_param, k_ids = jax.random.split(root)

    params = init_params(k_param)

    input_ids = jax.random.randint(k_ids, (B, S), 3, VOCAB, dtype=jnp.int32)
    input_ids = input_ids.at[:, 0].set(0)              # CLS token id 0
    attention_mask = jnp.ones((B, S), jnp.int32).at[1, 6:].set(0)

    fwd = jax.jit(lambda ids, mask: roberta_classifier_forward(params, ids, mask))
    out, binary_out = fwd(input_ids, attention_mask)
    jax.block_until_ready((out, binary_out))

    assert out.shape == (B, N_CLASSES) and binary_out.shape == (B, 2)
    print("KERNEL_OK")
</pallas_src>

<mosaic_0001>
module attributes {stable_mosaic.version = 11 : i64} {
  func.func @fused_roberta_kernel(%arg0: memref<16x32xf32, #tpu.memory_space<vmem>>, %arg1: memref<16x16xf32, #tpu.memory_space<vmem>>, %arg2: memref<1x32xf32, #tpu.memory_space<vmem>>, %arg3: memref<1x32xf32, #tpu.memory_space<vmem>>, %arg4: memref<2x32x96xbf16, #tpu.memory_space<vmem>>, %arg5: memref<2x1x96xf32, #tpu.memory_space<vmem>>, %arg6: memref<2x32x32xbf16, #tpu.memory_space<vmem>>, %arg7: memref<2x1x32xf32, #tpu.memory_space<vmem>>, %arg8: memref<2x1x32xf32, #tpu.memory_space<vmem>>, %arg9: memref<2x1x32xf32, #tpu.memory_space<vmem>>, %arg10: memref<2x32x128xbf16, #tpu.memory_space<vmem>>, %arg11: memref<2x1x128xf32, #tpu.memory_space<vmem>>, %arg12: memref<2x128x32xbf16, #tpu.memory_space<vmem>>, %arg13: memref<2x1x32xf32, #tpu.memory_space<vmem>>, %arg14: memref<2x1x32xf32, #tpu.memory_space<vmem>>, %arg15: memref<2x1x32xf32, #tpu.memory_space<vmem>>, %arg16: memref<32x32xbf16, #tpu.memory_space<vmem>>, %arg17: memref<1x32xf32, #tpu.memory_space<vmem>>, %arg18: memref<32x128xbf16, #tpu.memory_space<vmem>>, %arg19: memref<1x128xf32, #tpu.memory_space<vmem>>, %arg20: memref<2x128xf32, #tpu.memory_space<vmem>>, %arg21: memref<16x32xf32, #tpu.memory_space<vmem>>) attributes {dimension_semantics = [], scalar_prefetch = 0 : i64, scratch_operands = 1 : i64, tpu.core_type = #tpu.core_type<tc>} {
    %c0 = arith.constant 0 : index
    %c0_0 = arith.constant 0 : index
    %0 = vector.load %arg0[%c0, %c0_0] : memref<16x32xf32, #tpu.memory_space<vmem>>, vector<16x32xf32>
    %c0_1 = arith.constant 0 : index
    %c0_2 = arith.constant 0 : index
    %1 = vector.load %arg2[%c0_1, %c0_2] : memref<1x32xf32, #tpu.memory_space<vmem>>, vector<1x32xf32>
    %c0_3 = arith.constant 0 : index
    %c0_4 = arith.constant 0 : index
    %2 = vector.load %arg3[%c0_3, %c0_4] : memref<1x32xf32, #tpu.memory_space<vmem>>, vector<1x32xf32>
    %cst = arith.constant dense<0.000000e+00> : vector<16xf32>
    %3 = vector.multi_reduction <add>, %0, %cst [1] : vector<16x32xf32> to vector<16xf32>
    %4 = vector.shape_cast %3 : vector<16xf32> to vector<16x1xf32>
    %cst_5 = arith.constant 3.200000e+01 : f32
    %5 = vector.broadcast %cst_5 : f32 to vector<16x1xf32>
    %6 = arith.divf %4, %5 : vector<16x1xf32>
    %7 = vector.broadcast %6 : vector<16x1xf32> to vector<16x32xf32>
    %8 = arith.subf %0, %7 : vector<16x32xf32>
    %9 = arith.mulf %8, %8 : vector<16x32xf32>
    %cst_6 = arith.constant dense<0.000000e+00> : vector<16xf32>
    %10 = vector.multi_reduction <add>, %9, %cst_6 [1] : vector<16x32xf32> to vector<16xf32>
    %11 = vector.shape_cast %10 : vector<16xf32> to vector<16x1xf32>
    %cst_7 = arith.constant 3.200000e+01 : f32
    %12 = vector.broadcast %cst_7 : f32 to vector<16x1xf32>
    %13 = arith.divf %11, %12 : vector<16x1xf32>
    %14 = vector.broadcast %6 : vector<16x1xf32> to vector<16x32xf32>
    %15 = arith.subf %0, %14 : vector<16x32xf32>
    %cst_8 = arith.constant 9.99999974E-6 : f32
    %16 = vector.broadcast %cst_8 : f32 to vector<16x1xf32>
    %17 = arith.addf %13, %16 : vector<16x1xf32>
    %18 = math.rsqrt %17 : vector<16x1xf32>
    %19 = vector.broadcast %18 : vector<16x1xf32> to vector<16x32xf32>
    %20 = arith.mulf %15, %19 : vector<16x32xf32>
    %21 = vector.broadcast %1 : vector<1x32xf32> to vector<16x32xf32>
    %22 = arith.mulf %20, %21 : vector<16x32xf32>
    %23 = vector.broadcast %2 : vector<1x32xf32> to vector<16x32xf32>
    %24 = arith.addf %22, %23 : vector<16x32xf32>
    %c0_9 = arith.constant 0 : index
    %c0_10 = arith.constant 0 : index
    %25 = vector.load %arg1[%c0_9, %c0_10] : memref<16x16xf32, #tpu.memory_space<vmem>>, vector<16x16xf32>
    %26 = arith.truncf %24 : vector<16x32xf32> to vector<16x32xbf16>
    %c0_11 = arith.constant 0 : index
    %c0_12 = arith.constant 0 : index
    %c0_13 = arith.constant 0 : index
    %27 = vector.load %arg4[%c0_11, %c0_12, %c0_13] : memref<2x32x96xbf16, #tpu.memory_space<vmem>>, vector<1x32x96xbf16>
    %28 = vector.shape_cast %27 : vector<1x32x96xbf16> to vector<32x96xbf16>
    %cst_14 = arith.constant dense<0.000000e+00> : vector<16x96xf32>
    %29 = tpu.matmul %26, %28, %cst_14 {dimension_numbers = #tpu.dot_dimension_numbers<[1], [0], [0], [1], [0, 0, 1, 1], [], []>} : vector<16x32xbf16>, vector<32x96xbf16>, vector<16x96xf32> -> vector<16x96xf32>
    %c0_15 = arith.constant 0 : index
    %c0_16 = arith.constant 0 : index
    %c0_17 = arith.constant 0 : index
    %30 = vector.load %arg5[%c0_15, %c0_16, %c0_17] : memref<2x1x96xf32, #tpu.memory_space<vmem>>, vector<1x1x96xf32>
    %31 = vector.shape_cast %30 : vector<1x1x96xf32> to vector<1x96xf32>
    %32 = vector.broadcast %31 : vector<1x96xf32> to vector<16x96xf32>
    %33 = arith.addf %29, %32 : vector<16x96xf32>
    %34 = vector.extract_strided_slice %33 {offsets = [0, 0], sizes = [16, 16], strides = [1, 1]} : vector<16x96xf32> to vector<16x16xf32>
    %35 = arith.truncf %34 : vector<16x16xf32> to vector<16x16xbf16>
    %36 = vector.extract_strided_slice %33 {offsets = [0, 32], sizes = [16, 16], strides = [1, 1]} : vector<16x96xf32> to vector<16x16xf32>
    %37 = arith.truncf %36 : vector<16x16xf32> to vector<16x16xbf16>
    %38 = vector.extract_strided_slice %33 {offsets = [0, 64], sizes = [16, 16], strides = [1, 1]} : vector<16x96xf32> to vector<16x16xf32>
    %39 = arith.truncf %38 : vector<16x16xf32> to vector<16x16xbf16>
    %40 = tpu.transpose %37, [1, 0] : vector<16x16xbf16> -> vector<16x16xbf16>
    %cst_18 = arith.constant dense<0.000000e+00> : vector<16x16xf32>
    %41 = tpu.matmul %35, %40, %cst_18 {dimension_numbers = #tpu.dot_dimension_numbers<[1], [0], [0], [1], [0, 0, 1, 1], [], []>} : vector<16x16xbf16>, vector<16x16xbf16>, vector<16x16xf32> -> vector<16x16xf32>
    %cst_19 = arith.constant 2.500000e-01 : f32
    %42 = vector.broadcast %cst_19 : f32 to vector<16x16xf32>
    %43 = arith.mulf %41, %42 : vector<16x16xf32>
    %44 = arith.addf %43, %25 : vector<16x16xf32>
    %cst_20 = arith.constant dense<0xFF800000> : vector<16xf32>
    %45 = vector.multi_reduction <maximumf>, %44, %cst_20 [1] : vector<16x16xf32> to vector<16xf32>
    %46 = vector.shape_cast %45 : vector<16xf32> to vector<16x1xf32>
    %47 = vector.broadcast %46 : vector<16x1xf32> to vector<16x16xf32>
    %48 = arith.subf %44, %47 : vector<16x16xf32>
    %49 = math.exp %48 : vector<16x16xf32>
    %cst_21 = arith.constant dense<0.000000e+00> : vector<16xf32>
    %50 = vector.multi_reduction <add>, %49, %cst_21 [1] : vector<16x16xf32> to vector<16xf32>
    %51 = vector.shape_cast %50 : vector<16xf32> to vector<16x1xf32>
    %52 = tpu.reciprocal %51 {approx = true} : vector<16x1xf32> -> vector<16x1xf32>
    %53 = vector.broadcast %52 : vector<16x1xf32> to vector<16x16xf32>
    %54 = arith.mulf %49, %53 : vector<16x16xf32>
    %55 = arith.truncf %54 : vector<16x16xf32> to vector<16x16xbf16>
    %cst_22 = arith.constant dense<0.000000e+00> : vector<16x16xf32>
    %56 = tpu.matmul %55, %39, %cst_22 {dimension_numbers = #tpu.dot_dimension_numbers<[1], [0], [0], [1], [0, 0, 1, 1], [], []>} : vector<16x16xbf16>, vector<16x16xbf16>, vector<16x16xf32> -> vector<16x16xf32>
    %57 = vector.extract_strided_slice %33 {offsets = [0, 16], sizes = [16, 16], strides = [1, 1]} : vector<16x96xf32> to vector<16x16xf32>
    %58 = arith.truncf %57 : vector<16x16xf32> to vector<16x16xbf16>
    %59 = vector.extract_strided_slice %33 {offsets = [0, 48], sizes = [16, 16], strides = [1, 1]} : vector<16x96xf32> to vector<16x16xf32>
    %60 = arith.truncf %59 : vector<16x16xf32> to vector<16x16xbf16>
    %61 = vector.extract_strided_slice %33 {offsets = [0, 80], sizes = [16, 16], strides = [1, 1]} : vector<16x96xf32> to vector<16x16xf32>
    %62 = arith.truncf %61 : vector<16x16xf32> to vector<16x16xbf16>
    %63 = tpu.transpose %60, [1, 0] : vector<16x16xbf16> -> vector<16x16xbf16>
    %cst_23 = arith.constant dense<0.000000e+00> : vector<16x16xf32>
    %64 = tpu.matmul %58, %63, %cst_23 {dimension_numbers = #tpu.dot_dimension_numbers<[1], [0], [0], [1], [0, 0, 1, 1], [], []>} : vector<16x16xbf16>, vector<16x16xbf16>, vector<16x16xf32> -> vector<16x16xf32>
    %cst_24 = arith.constant 2.500000e-01 : f32
    %65 = vector.broadcast %cst_24 : f32 to vector<16x16xf32>
    %66 = arith.mulf %64, %65 : vector<16x16xf32>
    %67 = arith.addf %66, %25 : vector<16x16xf32>
    %cst_25 = arith.constant dense<0xFF800000> : vector<16xf32>
    %68 = vector.multi_reduction <maximumf>, %67, %cst_25 [1] : vector<16x16xf32> to vector<16xf32>
    %69 = vector.shape_cast %68 : vector<16xf32> to vector<16x1xf32>
    %70 = vector.broadcast %69 : vector<16x1xf32> to vector<16x16xf32>
    %71 = arith.subf %67, %70 : vector<16x16xf32>
    %72 = math.exp %71 : vector<16x16xf32>
    %cst_26 = arith.constant dense<0.000000e+00> : vector<16xf32>
    %73 = vector.multi_reduction <add>, %72, %cst_26 [1] : vector<16x16xf32> to vector<16xf32>
    %74 = vector.shape_cast %73 : vector<16xf32> to vector<16x1xf32>
    %75 = tpu.reciprocal %74 {approx = true} : vector<16x1xf32> -> vector<16x1xf32>
    %76 = vector.broadcast %75 : vector<16x1xf32> to vector<16x16xf32>
    %77 = arith.mulf %72, %76 : vector<16x16xf32>
    %78 = arith.truncf %77 : vector<16x16xf32> to vector<16x16xbf16>
    %cst_27 = arith.constant dense<0.000000e+00> : vector<16x16xf32>
    %79 = tpu.matmul %78, %62, %cst_27 {dimension_numbers = #tpu.dot_dimension_numbers<[1], [0], [0], [1], [0, 0, 1, 1], [], []>} : vector<16x16xbf16>, vector<16x16xbf16>, vector<16x16xf32> -> vector<16x16xf32>
    %80 = tpu.concatenate %56, %79 in 1 : vector<16x16xf32>, vector<16x16xf32> -> vector<16x32xf32>
    %81 = arith.truncf %80 : vector<16x32xf32> to vector<16x32xbf16>
    %c0_28 = arith.constant 0 : index
    %c0_29 = arith.constant 0 : index
    %c0_30 = arith.constant 0 : index
    %82 = vector.load %arg6[%c0_28, %c0_29, %c0_30] : memref<2x32x32xbf16, #tpu.memory_space<vmem>>, vector<1x32x32xbf16>
    %83 = vector.shape_cast %82 : vector<1x32x32xbf16> to vector<32x32xbf16>
    %cst_31 = arith.constant dense<0.000000e+00> : vector<16x32xf32>
    %84 = tpu.matmul %81, %83, %cst_31 {dimension_numbers = #tpu.dot_dimension_numbers<[1], [0], [0], [1], [0, 0, 1, 1], [], []>} : vector<16x32xbf16>, vector<32x32xbf16>, vector<16x32xf32> -> vector<16x32xf32>
    %c0_32 = arith.constant 0 : index
    %c0_33 = arith.constant 0 : index
    %c0_34 = arith.constant 0 : index
    %85 = vector.load %arg7[%c0_32, %c0_33, %c0_34] : memref<2x1x32xf32, #tpu.memory_space<vmem>>, vector<1x1x32xf32>
    %86 = vector.shape_cast %85 : vector<1x1x32xf32> to vector<1x32xf32>
    %87 = vector.broadcast %86 : vector<1x32xf32> to vector<16x32xf32>
    %88 = arith.addf %84, %87 : vector<16x32xf32>
    %89 = arith.addf %24, %88 : vector<16x32xf32>
    %c0_35 = arith.constant 0 : index
    %c0_36 = arith.constant 0 : index
    %c0_37 = arith.constant 0 : index
    %90 = vector.load %arg8[%c0_35, %c0_36, %c0_37] : memref<2x1x32xf32, #tpu.memory_space<vmem>>, vector<1x1x32xf32>
    %91 = vector.shape_cast %90 : vector<1x1x32xf32> to vector<1x32xf32>
    %c0_38 = arith.constant 0 : index
    %c0_39 = arith.constant 0 : index
    %c0_40 = arith.constant 0 : index
    %92 = vector.load %arg9[%c0_38, %c0_39, %c0_40] : memref<2x1x32xf32, #tpu.memory_space<vmem>>, vector<1x1x32xf32>
    %93 = vector.shape_cast %92 : vector<1x1x32xf32> to vector<1x32xf32>
    %cst_41 = arith.constant dense<0.000000e+00> : vector<16xf32>
    %94 = vector.multi_reduction <add>, %89, %cst_41 [1] : vector<16x32xf32> to vector<16xf32>
    %95 = vector.shape_cast %94 : vector<16xf32> to vector<16x1xf32>
    %cst_42 = arith.constant 3.200000e+01 : f32
    %96 = vector.broadcast %cst_42 : f32 to vector<16x1xf32>
    %97 = arith.divf %95, %96 : vector<16x1xf32>
    %98 = vector.broadcast %97 : vector<16x1xf32> to vector<16x32xf32>
    %99 = arith.subf %89, %98 : vector<16x32xf32>
    %100 = arith.mulf %99, %99 : vector<16x32xf32>
    %cst_43 = arith.constant dense<0.000000e+00> : vector<16xf32>
    %101 = vector.multi_reduction <add>, %100, %cst_43 [1] : vector<16x32xf32> to vector<16xf32>
    %102 = vector.shape_cast %101 : vector<16xf32> to vector<16x1xf32>
    %cst_44 = arith.constant 3.200000e+01 : f32
    %103 = vector.broadcast %cst_44 : f32 to vector<16x1xf32>
    %104 = arith.divf %102, %103 : vector<16x1xf32>
    %105 = vector.broadcast %97 : vector<16x1xf32> to vector<16x32xf32>
    %106 = arith.subf %89, %105 : vector<16x32xf32>
    %cst_45 = arith.constant 9.99999974E-6 : f32
    %107 = vector.broadcast %cst_45 : f32 to vector<16x1xf32>
    %108 = arith.addf %104, %107 : vector<16x1xf32>
    %109 = math.rsqrt %108 : vector<16x1xf32>
    %110 = vector.broadcast %109 : vector<16x1xf32> to vector<16x32xf32>
    %111 = arith.mulf %106, %110 : vector<16x32xf32>
    %112 = vector.broadcast %91 : vector<1x32xf32> to vector<16x32xf32>
    %113 = arith.mulf %111, %112 : vector<16x32xf32>
    %114 = vector.broadcast %93 : vector<1x32xf32> to vector<16x32xf32>
    %115 = arith.addf %113, %114 : vector<16x32xf32>
    %116 = arith.truncf %115 : vector<16x32xf32> to vector<16x32xbf16>
    %c0_46 = arith.constant 0 : index
    %c0_47 = arith.constant 0 : index
    %c0_48 = arith.constant 0 : index
    %117 = vector.load %arg10[%c0_46, %c0_47, %c0_48] : memref<2x32x128xbf16, #tpu.memory_space<vmem>>, vector<1x32x128xbf16>
    %118 = vector.shape_cast %117 : vector<1x32x128xbf16> to vector<32x128xbf16>
    %cst_49 = arith.constant dense<0.000000e+00> : vector<16x128xf32>
    %119 = tpu.matmul %116, %118, %cst_49 {dimension_numbers = #tpu.dot_dimension_numbers<[1], [0], [0], [1], [0, 0, 1, 1], [], []>} : vector<16x32xbf16>, vector<32x128xbf16>, vector<16x128xf32> -> vector<16x128xf32>
    %c0_50 = arith.constant 0 : index
    %c0_51 = arith.constant 0 : index
    %c0_52 = arith.constant 0 : index
    %120 = vector.load %arg11[%c0_50, %c0_51, %c0_52] : memref<2x1x128xf32, #tpu.memory_space<vmem>>, vector<1x1x128xf32>
    %121 = vector.shape_cast %120 : vector<1x1x128xf32> to vector<1x128xf32>
    %122 = vector.broadcast %121 : vector<1x128xf32> to vector<16x128xf32>
    %123 = arith.addf %119, %122 : vector<16x128xf32>
    %cst_53 = arith.constant 5.000000e-01 : f32
    %124 = vector.broadcast %cst_53 : f32 to vector<16x128xf32>
    %125 = arith.mulf %124, %123 : vector<16x128xf32>
    %cst_54 = arith.constant 4.471500e-02 : f32
    %126 = vector.broadcast %cst_54 : f32 to vector<16x128xf32>
    %127 = arith.mulf %126, %123 : vector<16x128xf32>
    %128 = arith.mulf %127, %123 : vector<16x128xf32>
    %129 = arith.mulf %128, %123 : vector<16x128xf32>
    %130 = arith.addf %123, %129 : vector<16x128xf32>
    %cst_55 = arith.constant 0.797884583 : f32
    %131 = vector.broadcast %cst_55 : f32 to vector<16x128xf32>
    %132 = arith.mulf %131, %130 : vector<16x128xf32>
    %133 = math.tanh %132 : vector<16x128xf32>
    %cst_56 = arith.constant 1.000000e+00 : f32
    %134 = vector.broadcast %cst_56 : f32 to vector<16x128xf32>
    %135 = arith.addf %134, %133 : vector<16x128xf32>
    %136 = arith.mulf %125, %135 : vector<16x128xf32>
    %137 = arith.truncf %136 : vector<16x128xf32> to vector<16x128xbf16>
    %c0_57 = arith.constant 0 : index
    %c0_58 = arith.constant 0 : index
    %c0_59 = arith.constant 0 : index
    %138 = vector.load %arg12[%c0_57, %c0_58, %c0_59] : memref<2x128x32xbf16, #tpu.memory_space<vmem>>, vector<1x128x32xbf16>
    %139 = vector.shape_cast %138 : vector<1x128x32xbf16> to vector<128x32xbf16>
    %cst_60 = arith.constant dense<0.000000e+00> : vector<16x32xf32>
    %140 = tpu.matmul %137, %139, %cst_60 {dimension_numbers = #tpu.dot_dimension_numbers<[1], [0], [0], [1], [0, 0, 1, 1], [], []>} : vector<16x128xbf16>, vector<128x32xbf16>, vector<16x32xf32> -> vector<16x32xf32>
    %c0_61 = arith.constant 0 : index
    %c0_62 = arith.constant 0 : index
    %c0_63 = arith.constant 0 : index
    %141 = vector.load %arg13[%c0_61, %c0_62, %c0_63] : memref<2x1x32xf32, #tpu.memory_space<vmem>>, vector<1x1x32xf32>
    %142 = vector.shape_cast %141 : vector<1x1x32xf32> to vector<1x32xf32>
    %143 = vector.broadcast %142 : vector<1x32xf32> to vector<16x32xf32>
    %144 = arith.addf %140, %143 : vector<16x32xf32>
    %145 = arith.addf %115, %144 : vector<16x32xf32>
    %c0_64 = arith.constant 0 : index
    %c0_65 = arith.constant 0 : index
    %c0_66 = arith.constant 0 : index
    %146 = vector.load %arg14[%c0_64, %c0_65, %c0_66] : memref<2x1x32xf32, #tpu.memory_space<vmem>>, vector<1x1x32xf32>
    %147 = vector.shape_cast %146 : vector<1x1x32xf32> to vector<1x32xf32>
    %c0_67 = arith.constant 0 : index
    %c0_68 = arith.constant 0 : index
    %c0_69 = arith.constant 0 : index
    %148 = vector.load %arg15[%c0_67, %c0_68, %c0_69] : memref<2x1x32xf32, #tpu.memory_space<vmem>>, vector<1x1x32xf32>
    %149 = vector.shape_cast %148 : vector<1x1x32xf32> to vector<1x32xf32>
    %cst_70 = arith.constant dense<0.000000e+00> : vector<16xf32>
    %150 = vector.multi_reduction <add>, %145, %cst_70 [1] : vector<16x32xf32> to vector<16xf32>
    %151 = vector.shape_cast %150 : vector<16xf32> to vector<16x1xf32>
    %cst_71 = arith.constant 3.200000e+01 : f32
    %152 = vector.broadcast %cst_71 : f32 to vector<16x1xf32>
    %153 = arith.divf %151, %152 : vector<16x1xf32>
    %154 = vector.broadcast %153 : vector<16x1xf32> to vector<16x32xf32>
    %155 = arith.subf %145, %154 : vector<16x32xf32>
    %156 = arith.mulf %155, %155 : vector<16x32xf32>
    %cst_72 = arith.constant dense<0.000000e+00> : vector<16xf32>
    %157 = vector.multi_reduction <add>, %156, %cst_72 [1] : vector<16x32xf32> to vector<16xf32>
    %158 = vector.shape_cast %157 : vector<16xf32> to vector<16x1xf32>
    %cst_73 = arith.constant 3.200000e+01 : f32
    %159 = vector.broadcast %cst_73 : f32 to vector<16x1xf32>
    %160 = arith.divf %158, %159 : vector<16x1xf32>
    %161 = vector.broadcast %153 : vector<16x1xf32> to vector<16x32xf32>
    %162 = arith.subf %145, %161 : vector<16x32xf32>
    %cst_74 = arith.constant 9.99999974E-6 : f32
    %163 = vector.broadcast %cst_74 : f32 to vector<16x1xf32>
    %164 = arith.addf %160, %163 : vector<16x1xf32>
    %165 = math.rsqrt %164 : vector<16x1xf32>
    %166 = vector.broadcast %165 : vector<16x1xf32> to vector<16x32xf32>
    %167 = arith.mulf %162, %166 : vector<16x32xf32>
    %168 = vector.broadcast %147 : vector<1x32xf32> to vector<16x32xf32>
    %169 = arith.mulf %167, %168 : vector<16x32xf32>
    %170 = vector.broadcast %149 : vector<1x32xf32> to vector<16x32xf32>
    %171 = arith.addf %169, %170 : vector<16x32xf32>
    %172 = arith.truncf %171 : vector<16x32xf32> to vector<16x32xbf16>
    %c1 = arith.constant 1 : index
    %c0_75 = arith.constant 0 : index
    %c0_76 = arith.constant 0 : index
    %173 = vector.load %arg4[%c1, %c0_75, %c0_76] : memref<2x32x96xbf16, #tpu.memory_space<vmem>>, vector<1x32x96xbf16>
    %174 = vector.shape_cast %173 : vector<1x32x96xbf16> to vector<32x96xbf16>
    %cst_77 = arith.constant dense<0.000000e+00> : vector<16x96xf32>
    %175 = tpu.matmul %172, %174, %cst_77 {dimension_numbers = #tpu.dot_dimension_numbers<[1], [0], [0], [1], [0, 0, 1, 1], [], []>} : vector<16x32xbf16>, vector<32x96xbf16>, vector<16x96xf32> -> vector<16x96xf32>
    %c1_78 = arith.constant 1 : index
    %c0_79 = arith.constant 0 : index
    %c0_80 = arith.constant 0 : index
    %176 = vector.load %arg5[%c1_78, %c0_79, %c0_80] : memref<2x1x96xf32, #tpu.memory_space<vmem>>, vector<1x1x96xf32>
    %177 = vector.shape_cast %176 : vector<1x1x96xf32> to vector<1x96xf32>
    %178 = vector.broadcast %177 : vector<1x96xf32> to vector<16x96xf32>
    %179 = arith.addf %175, %178 : vector<16x96xf32>
    %180 = vector.extract_strided_slice %179 {offsets = [0, 0], sizes = [16, 16], strides = [1, 1]} : vector<16x96xf32> to vector<16x16xf32>
    %181 = arith.truncf %180 : vector<16x16xf32> to vector<16x16xbf16>
    %182 = vector.extract_strided_slice %179 {offsets = [0, 32], sizes = [16, 16], strides = [1, 1]} : vector<16x96xf32> to vector<16x16xf32>
    %183 = arith.truncf %182 : vector<16x16xf32> to vector<16x16xbf16>
    %184 = vector.extract_strided_slice %179 {offsets = [0, 64], sizes = [16, 16], strides = [1, 1]} : vector<16x96xf32> to vector<16x16xf32>
    %185 = arith.truncf %184 : vector<16x16xf32> to vector<16x16xbf16>
    %186 = tpu.transpose %183, [1, 0] : vector<16x16xbf16> -> vector<16x16xbf16>
    %cst_81 = arith.constant dense<0.000000e+00> : vector<16x16xf32>
    %187 = tpu.matmul %181, %186, %cst_81 {dimension_numbers = #tpu.dot_dimension_numbers<[1], [0], [0], [1], [0, 0, 1, 1], [], []>} : vector<16x16xbf16>, vector<16x16xbf16>, vector<16x16xf32> -> vector<16x16xf32>
    %cst_82 = arith.constant 2.500000e-01 : f32
    %188 = vector.broadcast %cst_82 : f32 to vector<16x16xf32>
    %189 = arith.mulf %187, %188 : vector<16x16xf32>
    %190 = arith.addf %189, %25 : vector<16x16xf32>
    %cst_83 = arith.constant dense<0xFF800000> : vector<16xf32>
    %191 = vector.multi_reduction <maximumf>, %190, %cst_83 [1] : vector<16x16xf32> to vector<16xf32>
    %192 = vector.shape_cast %191 : vector<16xf32> to vector<16x1xf32>
    %193 = vector.broadcast %192 : vector<16x1xf32> to vector<16x16xf32>
    %194 = arith.subf %190, %193 : vector<16x16xf32>
    %195 = math.exp %194 : vector<16x16xf32>
    %cst_84 = arith.constant dense<0.000000e+00> : vector<16xf32>
    %196 = vector.multi_reduction <add>, %195, %cst_84 [1] : vector<16x16xf32> to vector<16xf32>
    %197 = vector.shape_cast %196 : vector<16xf32> to vector<16x1xf32>
    %198 = tpu.reciprocal %197 {approx = true} : vector<16x1xf32> -> vector<16x1xf32>
    %199 = vector.broadcast %198 : vector<16x1xf32> to vector<16x16xf32>
    %200 = arith.mulf %195, %199 : vector<16x16xf32>
    %201 = arith.truncf %200 : vector<16x16xf32> to vector<16x16xbf16>
    %cst_85 = arith.constant dense<0.000000e+00> : vector<16x16xf32>
    %202 = tpu.matmul %201, %185, %cst_85 {dimension_numbers = #tpu.dot_dimension_numbers<[1], [0], [0], [1], [0, 0, 1, 1], [], []>} : vector<16x16xbf16>, vector<16x16xbf16>, vector<16x16xf32> -> vector<16x16xf32>
    %203 = vector.extract_strided_slice %179 {offsets = [0, 16], sizes = [16, 16], strides = [1, 1]} : vector<16x96xf32> to vector<16x16xf32>
    %204 = arith.truncf %203 : vector<16x16xf32> to vector<16x16xbf16>
    %205 = vector.extract_strided_slice %179 {offsets = [0, 48], sizes = [16, 16], strides = [1, 1]} : vector<16x96xf32> to vector<16x16xf32>
    %206 = arith.truncf %205 : vector<16x16xf32> to vector<16x16xbf16>
    %207 = vector.extract_strided_slice %179 {offsets = [0, 80], sizes = [16, 16], strides = [1, 1]} : vector<16x96xf32> to vector<16x16xf32>
    %208 = arith.truncf %207 : vector<16x16xf32> to vector<16x16xbf16>
    %209 = tpu.transpose %206, [1, 0] : vector<16x16xbf16> -> vector<16x16xbf16>
    %cst_86 = arith.constant dense<0.000000e+00> : vector<16x16xf32>
    %210 = tpu.matmul %204, %209, %cst_86 {dimension_numbers = #tpu.dot_dimension_numbers<[1], [0], [0], [1], [0, 0, 1, 1], [], []>} : vector<16x16xbf16>, vector<16x16xbf16>, vector<16x16xf32> -> vector<16x16xf32>
    %cst_87 = arith.constant 2.500000e-01 : f32
    %211 = vector.broadcast %cst_87 : f32 to vector<16x16xf32>
    %212 = arith.mulf %210, %211 : vector<16x16xf32>
    %213 = arith.addf %212, %25 : vector<16x16xf32>
    %cst_88 = arith.constant dense<0xFF800000> : vector<16xf32>
    %214 = vector.multi_reduction <maximumf>, %213, %cst_88 [1] : vector<16x16xf32> to vector<16xf32>
    %215 = vector.shape_cast %214 : vector<16xf32> to vector<16x1xf32>
    %216 = vector.broadcast %215 : vector<16x1xf32> to vector<16x16xf32>
    %217 = arith.subf %213, %216 : vector<16x16xf32>
    %218 = math.exp %217 : vector<16x16xf32>
    %cst_89 = arith.constant dense<0.000000e+00> : vector<16xf32>
    %219 = vector.multi_reduction <add>, %218, %cst_89 [1] : vector<16x16xf32> to vector<16xf32>
    %220 = vector.shape_cast %219 : vector<16xf32> to vector<16x1xf32>
    %221 = tpu.reciprocal %220 {approx = true} : vector<16x1xf32> -> vector<16x1xf32>
    %222 = vector.broadcast %221 : vector<16x1xf32> to vector<16x16xf32>
    %223 = arith.mulf %218, %222 : vector<16x16xf32>
    %224 = arith.truncf %223 : vector<16x16xf32> to vector<16x16xbf16>
    %cst_90 = arith.constant dense<0.000000e+00> : vector<16x16xf32>
    %225 = tpu.matmul %224, %208, %cst_90 {dimension_numbers = #tpu.dot_dimension_numbers<[1], [0], [0], [1], [0, 0, 1, 1], [], []>} : vector<16x16xbf16>, vector<16x16xbf16>, vector<16x16xf32> -> vector<16x16xf32>
    %226 = tpu.concatenate %202, %225 in 1 : vector<16x16xf32>, vector<16x16xf32> -> vector<16x32xf32>
    %227 = arith.truncf %226 : vector<16x32xf32> to vector<16x32xbf16>
    %c1_91 = arith.constant 1 : index
    %c0_92 = arith.constant 0 : index
    %c0_93 = arith.constant 0 : index
    %228 = vector.load %arg6[%c1_91, %c0_92, %c0_93] : memref<2x32x32xbf16, #tpu.memory_space<vmem>>, vector<1x32x32xbf16>
    %229 = vector.shape_cast %228 : vector<1x32x32xbf16> to vector<32x32xbf16>
    %cst_94 = arith.constant dense<0.000000e+00> : vector<16x32xf32>
    %230 = tpu.matmul %227, %229, %cst_94 {dimension_numbers = #tpu.dot_dimension_numbers<[1], [0], [0], [1], [0, 0, 1, 1], [], []>} : vector<16x32xbf16>, vector<32x32xbf16>, vector<16x32xf32> -> vector<16x32xf32>
    %c1_95 = arith.constant 1 : index
    %c0_96 = arith.constant 0 : index
    %c0_97 = arith.constant 0 : index
    %231 = vector.load %arg7[%c1_95, %c0_96, %c0_97] : memref<2x1x32xf32, #tpu.memory_space<vmem>>, vector<1x1x32xf32>
    %232 = vector.shape_cast %231 : vector<1x1x32xf32> to vector<1x32xf32>
    %233 = vector.broadcast %232 : vector<1x32xf32> to vector<16x32xf32>
    %234 = arith.addf %230, %233 : vector<16x32xf32>
    %235 = arith.addf %171, %234 : vector<16x32xf32>
    %c1_98 = arith.constant 1 : index
    %c0_99 = arith.constant 0 : index
    %c0_100 = arith.constant 0 : index
    %236 = vector.load %arg8[%c1_98, %c0_99, %c0_100] : memref<2x1x32xf32, #tpu.memory_space<vmem>>, vector<1x1x32xf32>
    %237 = vector.shape_cast %236 : vector<1x1x32xf32> to vector<1x32xf32>
    %c1_101 = arith.constant 1 : index
    %c0_102 = arith.constant 0 : index
    %c0_103 = arith.constant 0 : index
    %238 = vector.load %arg9[%c1_101, %c0_102, %c0_103] : memref<2x1x32xf32, #tpu.memory_space<vmem>>, vector<1x1x32xf32>
    %239 = vector.shape_cast %238 : vector<1x1x32xf32> to vector<1x32xf32>
    %cst_104 = arith.constant dense<0.000000e+00> : vector<16xf32>
    %240 = vector.multi_reduction <add>, %235, %cst_104 [1] : vector<16x32xf32> to vector<16xf32>
    %241 = vector.shape_cast %240 : vector<16xf32> to vector<16x1xf32>
    %cst_105 = arith.constant 3.200000e+01 : f32
    %242 = vector.broadcast %cst_105 : f32 to vector<16x1xf32>
    %243 = arith.divf %241, %242 : vector<16x1xf32>
    %244 = vector.broadcast %243 : vector<16x1xf32> to vector<16x32xf32>
    %245 = arith.subf %235, %244 : vector<16x32xf32>
    %246 = arith.mulf %245, %245 : vector<16x32xf32>
    %cst_106 = arith.constant dense<0.000000e+00> : vector<16xf32>
    %247 = vector.multi_reduction <add>, %246, %cst_106 [1] : vector<16x32xf32> to vector<16xf32>
    %248 = vector.shape_cast %247 : vector<16xf32> to vector<16x1xf32>
    %cst_107 = arith.constant 3.200000e+01 : f32
    %249 = vector.broadcast %cst_107 : f32 to vector<16x1xf32>
    %250 = arith.divf %248, %249 : vector<16x1xf32>
    %251 = vector.broadcast %243 : vector<16x1xf32> to vector<16x32xf32>
    %252 = arith.subf %235, %251 : vector<16x32xf32>
    %cst_108 = arith.constant 9.99999974E-6 : f32
    %253 = vector.broadcast %cst_108 : f32 to vector<16x1xf32>
    %254 = arith.addf %250, %253 : vector<16x1xf32>
    %255 = math.rsqrt %254 : vector<16x1xf32>
    %256 = vector.broadcast %255 : vector<16x1xf32> to vector<16x32xf32>
    %257 = arith.mulf %252, %256 : vector<16x32xf32>
    %258 = vector.broadcast %237 : vector<1x32xf32> to vector<16x32xf32>
    %259 = arith.mulf %257, %258 : vector<16x32xf32>
    %260 = vector.broadcast %239 : vector<1x32xf32> to vector<16x32xf32>
    %261 = arith.addf %259, %260 : vector<16x32xf32>
    %262 = arith.truncf %261 : vector<16x32xf32> to vector<16x32xbf16>
    %c1_109 = arith.constant 1 : index
    %c0_110 = arith.constant 0 : index
    %c0_111 = arith.constant 0 : index
    %263 = vector.load %arg10[%c1_109, %c0_110, %c0_111] : memref<2x32x128xbf16, #tpu.memory_space<vmem>>, vector<1x32x128xbf16>
    %264 = vector.shape_cast %263 : vector<1x32x128xbf16> to vector<32x128xbf16>
    %cst_112 = arith.constant dense<0.000000e+00> : vector<16x128xf32>
    %265 = tpu.matmul %262, %264, %cst_112 {dimension_numbers = #tpu.dot_dimension_numbers<[1], [0], [0], [1], [0, 0, 1, 1], [], []>} : vector<16x32xbf16>, vector<32x128xbf16>, vector<16x128xf32> -> vector<16x128xf32>
    %c1_113 = arith.constant 1 : index
    %c0_114 = arith.constant 0 : index
    %c0_115 = arith.constant 0 : index
    %266 = vector.load %arg11[%c1_113, %c0_114, %c0_115] : memref<2x1x128xf32, #tpu.memory_space<vmem>>, vector<1x1x128xf32>
    %267 = vector.shape_cast %266 : vector<1x1x128xf32> to vector<1x128xf32>
    %268 = vector.broadcast %267 : vector<1x128xf32> to vector<16x128xf32>
    %269 = arith.addf %265, %268 : vector<16x128xf32>
    %cst_116 = arith.constant 5.000000e-01 : f32
    %270 = vector.broadcast %cst_116 : f32 to vector<16x128xf32>
    %271 = arith.mulf %270, %269 : vector<16x128xf32>
    %cst_117 = arith.constant 4.471500e-02 : f32
    %272 = vector.broadcast %cst_117 : f32 to vector<16x128xf32>
    %273 = arith.mulf %272, %269 : vector<16x128xf32>
    %274 = arith.mulf %273, %269 : vector<16x128xf32>
    %275 = arith.mulf %274, %269 : vector<16x128xf32>
    %276 = arith.addf %269, %275 : vector<16x128xf32>
    %cst_118 = arith.constant 0.797884583 : f32
    %277 = vector.broadcast %cst_118 : f32 to vector<16x128xf32>
    %278 = arith.mulf %277, %276 : vector<16x128xf32>
    %279 = math.tanh %278 : vector<16x128xf32>
    %cst_119 = arith.constant 1.000000e+00 : f32
    %280 = vector.broadcast %cst_119 : f32 to vector<16x128xf32>
    %281 = arith.addf %280, %279 : vector<16x128xf32>
    %282 = arith.mulf %271, %281 : vector<16x128xf32>
    %283 = arith.truncf %282 : vector<16x128xf32> to vector<16x128xbf16>
    %c1_120 = arith.constant 1 : index
    %c0_121 = arith.constant 0 : index
    %c0_122 = arith.constant 0 : index
    %284 = vector.load %arg12[%c1_120, %c0_121, %c0_122] : memref<2x128x32xbf16, #tpu.memory_space<vmem>>, vector<1x128x32xbf16>
    %285 = vector.shape_cast %284 : vector<1x128x32xbf16> to vector<128x32xbf16>
    %cst_123 = arith.constant dense<0.000000e+00> : vector<16x32xf32>
    %286 = tpu.matmul %283, %285, %cst_123 {dimension_numbers = #tpu.dot_dimension_numbers<[1], [0], [0], [1], [0, 0, 1, 1], [], []>} : vector<16x128xbf16>, vector<128x32xbf16>, vector<16x32xf32> -> vector<16x32xf32>
    %c1_124 = arith.constant 1 : index
    %c0_125 = arith.constant 0 : index
    %c0_126 = arith.constant 0 : index
    %287 = vector.load %arg13[%c1_124, %c0_125, %c0_126] : memref<2x1x32xf32, #tpu.memory_space<vmem>>, vector<1x1x32xf32>
    %288 = vector.shape_cast %287 : vector<1x1x32xf32> to vector<1x32xf32>
    %289 = vector.broadcast %288 : vector<1x32xf32> to vector<16x32xf32>
    %290 = arith.addf %286, %289 : vector<16x32xf32>
    %291 = arith.addf %261, %290 : vector<16x32xf32>
    %c1_127 = arith.constant 1 : index
    %c0_128 = arith.constant 0 : index
    %c0_129 = arith.constant 0 : index
    %292 = vector.load %arg14[%c1_127, %c0_128, %c0_129] : memref<2x1x32xf32, #tpu.memory_space<vmem>>, vector<1x1x32xf32>
    %293 = vector.shape_cast %292 : vector<1x1x32xf32> to vector<1x32xf32>
    %c1_130 = arith.constant 1 : index
    %c0_131 = arith.constant 0 : index
    %c0_132 = arith.constant 0 : index
    %294 = vector.load %arg15[%c1_130, %c0_131, %c0_132] : memref<2x1x32xf32, #tpu.memory_space<vmem>>, vector<1x1x32xf32>
    %295 = vector.shape_cast %294 : vector<1x1x32xf32> to vector<1x32xf32>
    %cst_133 = arith.constant dense<0.000000e+00> : vector<16xf32>
    %296 = vector.multi_reduction <add>, %291, %cst_133 [1] : vector<16x32xf32> to vector<16xf32>
    %297 = vector.shape_cast %296 : vector<16xf32> to vector<16x1xf32>
    %cst_134 = arith.constant 3.200000e+01 : f32
    %298 = vector.broadcast %cst_134 : f32 to vector<16x1xf32>
    %299 = arith.divf %297, %298 : vector<16x1xf32>
    %300 = vector.broadcast %299 : vector<16x1xf32> to vector<16x32xf32>
    %301 = arith.subf %291, %300 : vector<16x32xf32>
    %302 = arith.mulf %301, %301 : vector<16x32xf32>
    %cst_135 = arith.constant dense<0.000000e+00> : vector<16xf32>
    %303 = vector.multi_reduction <add>, %302, %cst_135 [1] : vector<16x32xf32> to vector<16xf32>
    %304 = vector.shape_cast %303 : vector<16xf32> to vector<16x1xf32>
    %cst_136 = arith.constant 3.200000e+01 : f32
    %305 = vector.broadcast %cst_136 : f32 to vector<16x1xf32>
    %306 = arith.divf %304, %305 : vector<16x1xf32>
    %307 = vector.broadcast %299 : vector<16x1xf32> to vector<16x32xf32>
    %308 = arith.subf %291, %307 : vector<16x32xf32>
    %cst_137 = arith.constant 9.99999974E-6 : f32
    %309 = vector.broadcast %cst_137 : f32 to vector<16x1xf32>
    %310 = arith.addf %306, %309 : vector<16x1xf32>
    %311 = math.rsqrt %310 : vector<16x1xf32>
    %312 = vector.broadcast %311 : vector<16x1xf32> to vector<16x32xf32>
    %313 = arith.mulf %308, %312 : vector<16x32xf32>
    %314 = vector.broadcast %293 : vector<1x32xf32> to vector<16x32xf32>
    %315 = arith.mulf %313, %314 : vector<16x32xf32>
    %316 = vector.broadcast %295 : vector<1x32xf32> to vector<16x32xf32>
    %317 = arith.addf %315, %316 : vector<16x32xf32>
    %c0_138 = arith.constant 0 : index
    %c0_139 = arith.constant 0 : index
    %318 = vector.load %arg21[%c0_138, %c0_139] : memref<16x32xf32, #tpu.memory_space<vmem>>, vector<16x32xf32>
    tpu.vector_store %arg21[%c0_138, %c0_139], %317 {strides = array<i32>} : memref<16x32xf32, #tpu.memory_space<vmem>>, vector<16x32xf32>,
    %c0_140 = arith.constant 0 : index
    %c0_141 = arith.constant 0 : index
    %319 = tpu.strided_load %arg21[%c0_140, %c0_141] {strides = array<i32: 8, 1>} : memref<16x32xf32, #tpu.memory_space<vmem>>, vector<2x32xf32>
    %320 = arith.truncf %319 : vector<2x32xf32> to vector<2x32xbf16>
    %c0_142 = arith.constant 0 : index
    %c0_143 = arith.constant 0 : index
    %321 = vector.load %arg16[%c0_142, %c0_143] : memref<32x32xbf16, #tpu.memory_space<vmem>>, vector<32x32xbf16>
    %cst_144 = arith.constant dense<0.000000e+00> : vector<2x32xf32>
    %322 = tpu.matmul %320, %321, %cst_144 {dimension_numbers = #tpu.dot_dimension_numbers<[1], [0], [0], [1], [0, 0, 1, 1], [], []>} : vector<2x32xbf16>, vector<32x32xbf16>, vector<2x32xf32> -> vector<2x32xf32>
    %c0_145 = arith.constant 0 : index
    %c0_146 = arith.constant 0 : index
    %323 = vector.load %arg17[%c0_145, %c0_146] : memref<1x32xf32, #tpu.memory_space<vmem>>, vector<1x32xf32>
    %324 = vector.broadcast %323 : vector<1x32xf32> to vector<2x32xf32>
    %325 = arith.addf %322, %324 : vector<2x32xf32>
    %326 = math.tanh %325 : vector<2x32xf32>
    %327 = arith.truncf %326 : vector<2x32xf32> to vector<2x32xbf16>
    %c0_147 = arith.constant 0 : index
    %c0_148 = arith.constant 0 : index
    %328 = vector.load %arg18[%c0_147, %c0_148] : memref<32x128xbf16, #tpu.memory_space<vmem>>, vector<32x128xbf16>
    %cst_149 = arith.constant dense<0.000000e+00> : vector<2x128xf32>
    %329 = tpu.matmul %327, %328, %cst_149 {dimension_numbers = #tpu.dot_dimension_numbers<[1], [0], [0], [1], [0, 0, 1, 1], [], []>} : vector<2x32xbf16>, vector<32x128xbf16>, vector<2x128xf32> -> vector<2x128xf32>
    %c0_150 = arith.constant 0 : index
    %c0_151 = arith.constant 0 : index
    %330 = vector.load %arg19[%c0_150, %c0_151] : memref<1x128xf32, #tpu.memory_space<vmem>>, vector<1x128xf32>
    %331 = vector.broadcast %330 : vector<1x128xf32> to vector<2x128xf32>
    %332 = arith.addf %329, %331 : vector<2x128xf32>
    %c0_152 = arith.constant 0 : index
    %c0_153 = arith.constant 0 : index
    %333 = vector.load %arg20[%c0_152, %c0_153] : memref<2x128xf32, #tpu.memory_space<vmem>>, vector<2x128xf32>
    tpu.vector_store %arg20[%c0_152, %c0_153], %332 {strides = array<i32>} : memref<2x128xf32, #tpu.memory_space<vmem>>, vector<2x128xf32>,
    return
  }
}

</mosaic_0001>

<bundles_post_ra>
// kernel: _lambda_.1
= control target key start
LH: loop header
LB: loop body
LE: loop exit
PB: predicated region body
PF: predicated region fallthrough
CT: control target
= control target key end

     0   :  { %vm70_vm0 = vcmask 261120   ;;  %v2072_v15 = vmov 0.0   ;;  %vm2073_vm1 = vmmov 0   ;;  %s2075_s25 = smov 96   ;;  %vm188_vm2 = vcmask 130048   ;;  %s2566_s0 = inlined_call_operand.vmem [shape: f32[16,32], index: 0, kind: input, shape index: {}]   ;;  %s2567_s4 = inlined_call_operand.vmem [shape: bf16[2,32,96], index: 4, kind: input, shape index: {}]   ;;  %s2568_s2 = inlined_call_operand.vmem [shape: f32[1,32], index: 2, kind: input, shape index: {}]   ;;  %s2569_s3 = inlined_call_operand.vmem [shape: f32[1,32], index: 3, kind: input, shape index: {}]   ;;  %s2570_s5 = inlined_call_operand.vmem [shape: f32[2,1,96], index: 5, kind: input, shape index: {}]   ;;  %s2571_s1 = inlined_call_operand.vmem [shape: f32[16,16], index: 1, kind: input, shape index: {}]   ;;  %s2572_s6 = inlined_call_operand.vmem [shape: bf16[2,32,32], index: 6, kind: input, shape index: {}]   ;;  %s2573_s7 = inlined_call_operand.vmem [shape: f32[2,1,32], index: 7, kind: input, shape index: {}]   ;;  %s2574_s10 = inlined_call_operand.vmem [shape: bf16[2,32,128], index: 10, kind: input, shape index: {}]   ;;  %s2575_s8 = inlined_call_operand.vmem [shape: f32[2,1,32], index: 8, kind: input, shape index: {}, may-alias: {8,14}]   ;;  %s2576_s9 = inlined_call_operand.vmem [shape: f32[2,1,32], index: 9, kind: input, shape index: {}, may-alias: {9,15}]   ;;  %s2577_s12 = inlined_call_operand.vmem [shape: bf16[2,128,32], index: 12, kind: input, shape index: {}]   ;;  %s2578_s11 = inlined_call_operand.vmem [shape: f32[2,1,128], index: 11, kind: input, shape index: {}]   ;;  %s2579_s13 = inlined_call_operand.vmem [shape: f32[2,1,32], index: 13, kind: input, shape index: {}]   ;;  %s2580_s14 = inlined_call_operand.vmem [shape: f32[2,1,32], index: 14, kind: input, shape index: {}, may-alias: {8,14}]   ;;  %s2581_s15 = inlined_call_operand.vmem [shape: f32[2,1,32], index: 15, kind: input, shape index: {}, may-alias: {9,15}]   ;;  %s2582_s16 = inlined_call_operand.vmem [shape: bf16[32,32], index: 16, kind: input, shape index: {}]   ;;  %s2583_s18 = inlined_call_operand.vmem [shape: bf16[32,128], index: 18, kind: input, shape index: {}]   ;;  %s2584_s17 = inlined_call_operand.vmem [shape: f32[1,32], index: 17, kind: input, shape index: {}]   ;;  %s2585_s19 = inlined_call_operand.vmem [shape: f32[1,128], index: 19, kind: input, shape index: {}]   ;;  %s2586_s20 = inlined_call_operand.vmem [shape: f32[2,128], index: 20, kind: output, shape index: {}]  }
   0x1   :  { %2590 = sst [smem:[#allocation3_spill]] %s2566_s0  ;;  %1808 = vmatprep.subr.bf16.mxu1 %v2072_v15  ;;  %1822 = vmatprep.subr.bf16.mxu0 %v2072_v15  ;;  %v2249_v48 = vld [vmem:[%s2571_s1] sm:$0xff]  ;;  %v2254_v52 = vld [vmem:[%s2571_s1 + $0x8] sm:$0xff]  ;;  %s2077_s1 = smov 64  }
   0x2   :  { %2591 = sst [smem:[#allocation4_spill]] %s2567_s4  ;;  %s2595_s23 = sld [smem:[#allocation3_spill]]  ;;  %1812 = vmatprep.mubr.msk.bf16.mxu1 %vm2073_vm1, %v2072_v15  ;;  %1824 = vmatprep.mubr.msk.bf16.mxu0 %vm2073_vm1, %v2072_v15 }
   0x3   :  { %2592 = sst [smem:[#allocation5_spill]] %s2568_s2  ;;  %s2596_s26 = sld [smem:[#allocation4_spill]] }
   0x4   :  { %2593 = sst [smem:[#allocation6_spill]] %s2569_s3  ;;  %s2597_s30 = sld [smem:[#allocation5_spill]] }
   0x5   :  { %2594 = sst [smem:[#allocation7_spill]] %s2570_s5  ;;  %s2598_s4 = sld [smem:[#allocation6_spill]] }
   0x6   :  { %s2599_s24 = sld [smem:[#allocation7_spill]]  ;;  %s2074_s2 = smov 80  }
   0x7   :  { %s2076_s3 = smov 112  }
   0x8   :  { %v66_v0 = vld [vmem:[%s2595_s23] sm:$0xff]  ;;  %v67_v1 = vld [vmem:[%s2595_s23 + $0x8] sm:$0xff]  ;;  %s2079_s23 = smov 16  }
   0x9   :  { %v71_v2 = vsel %vm70_vm0, %v66_v0, 0.0  ;;  %v74_v3 = vsel %vm70_vm0, %v67_v1, 0.0  ;;  %v1978_v14 = vld [vmem:[%s2596_s26] sm:$0xff]   ;;  %v1979_v16 = vld [vmem:[%s2596_s26 + $0x8] sm:$0xff]  }
   0xa   :  { %72 = vadd.xlane.f32.xlu0 %v71_v2  ;;  %1809 = vmatpush3.bf16.msra.mxu1 %v1978_v14  ;;  %v1646_v25 = vld [vmem:[%s2597_s30] ss:$0 sm:$0xff]  ;;  %s2078_s30 = smov 48  }
   0xb   :  { %1810 = vmatprep.subr.bf16.mxu1 %v2072_v15  ;;  %v1647_v29 = vld [vmem:[%s2598_s4] ss:$0 sm:$0xff] }
   0xc   :  { %v1648_v34 = vld [vmem:[%s2599_s24] ss:$0 sm:$0xff] }
   0xe   :  { %75 = vadd.xlane.f32.xlu0 %v74_v3  ;;  %1811 = vmatpush3.bf16.msra.mxu1 %v1979_v16 }
   0xf   :  { %1816 = vmatprep.subr.bf16.mxu1 %v2072_v15 }
  0x97   :  { %v73_v4 = vpop.xlane.xlu0 %72 }
  0x98   :  { %v78_v5 = vmul.f32 0.03125, %v73_v4 }
  0x9a   :  { %v80_v6 = vsub.f32 %v66_v0, %v78_v5 }
  0x9b   :  { %v76_v7 = vpop.xlane.xlu0 %75 }
  0x9c   :  { %v79_v8 = vmul.f32 0.03125, %v76_v7  ;;  %v82_v9 = vmul.f32 %v80_v6, %v80_v6 }
  0x9e   :  { %v81_v10 = vsub.f32 %v67_v1, %v79_v8  ;;  %v84_v11 = vsel %vm70_vm0, %v82_v9, 0.0 }
  0x9f   :  { %85 = vadd.xlane.f32.xlu1 %v84_v11 }
  0xa0   :  { %v83_v12 = vmul.f32 %v81_v10, %v81_v10 }
  0xa2   :  { %v87_v13 = vsel %vm70_vm0, %v83_v12, 0.0 }
  0xa3   :  { %88 = vadd.xlane.f32.xlu1 %v87_v13 }
 0x12c   :  { %v86_v17 = vpop.xlane.xlu1 %85 }
 0x12d   :  { %v90_v18 = vmul.f32 0.03125, %v86_v17 }
 0x12f   :  { %v92_v19 = vadd.f32 1e-05, %v90_v18 }
 0x130   :  { %v89_v20 = vpop.xlane.xlu1 %88 }
 0x131   :  { %2010 = vrsqrt.f32 %v92_v19  ;;  %v91_v21 = vmul.f32 0.03125, %v89_v20 }
 0x133   :  { %v93_v22 = vadd.f32 1e-05, %v91_v21 }
 0x135   :  { %2012 = vrsqrt.f32 %v93_v22 }
 0x13b   :  { %v2011_v23 = vpop.eup %2010 }
 0x13c   :  { %v96_v24 = vmul.f32 %v2011_v23, %v80_v6 }
 0x13e   :  { %v104_v28 = vmul.f32 %v1646_v25, %v96_v24 }
 0x13f   :  { %v2013_v26 = vpop.eup %2012 }
 0x140   :  { %v97_v27 = vmul.f32 %v2013_v26, %v81_v10  ;;  %v2215_v31 = vadd.f32 %v1647_v29, %v104_v28 }
 0x142   :  { %v105_v30 = vmul.f32 %v1646_v25, %v97_v27 }
 0x144   :  { %v2217_v32 = vadd.f32 %v1647_v29, %v105_v30 }
 0x146   :  { %v116_v33 = vpack.c.bf16 %v2217_v32, %v2215_v31 }
 0x148   :  { %1813 = vmatmul.mubr.msk.bf16.vlgmr.msra.gmra.mrb[0].mxu1 %vm70_vm0, %v116_v33 }
 0x149   :  { %1818 = vmatprep.mubr.msk.bf16.mxu1 %vm2073_vm1, %v2072_v15 }
 0x21b   :  { %v177_v35 = vpop.f32.mrb[0].mxu1 }
 0x21c   :  { %v1814_v36 = vpop.f32.mrb[1].mxu1  ;;  %v178_v38 = vadd.f32 %v1648_v34, %v177_v35 }
 0x21d   :  { %v180_v37 = vpop.f32.mrb[2].mxu1 }
 0x21e   :  { %v181_v39 = vadd.f32 %v1648_v34, %v180_v37  ;;  %v1815_v40 = vpop.f32.mrb[3].mxu1 }
 0x220   :  { %v2227_v41 = vpack.c.bf16 %v181_v39, %v178_v38 }
 0x222   :  { %312 = vrot.lane.b32.xlu1 %v2227_v41, %s2074_s2  ;;  %186 = vrot.lane.b32.xlu0 %v2227_v41, %s2075_s25 }
 0x226   :  { %310 = vrot.lane.b32.xlu1 %v2227_v41, %s2076_s3 }
 0x294   :  { %v187_v42 = vpop.permute.xlu0 %186  ;;  %v313_v44 = vpop.permute.xlu1 %312 }
 0x295   :  { %v193_v43 = vsel %vm188_vm2, %v187_v42, 0  ;;  %v318_v45 = vsel %vm188_vm2, %v313_v44, 0  ;;  %v1980_v44 = vld [vmem:[%s2572_s6] sm:$0xff]  }
 0x296   :  { %1817 = vmatpush3.bf16.xpose.msra.mxu1 %v193_v43 }
 0x297   :  { %1828 = vmatprep.subr.bf16.mxu1 %v2072_v15 }
 0x298   :  { %v311_v46 = vpop.permute.xlu1 %310 }
 0x29d   :  { %1819 = vmatmul.mubr.msk.bf16.vlgmr.msra.gmra.mrb[4].mxu1 %vm188_vm2, %v2227_v41 }
 0x29e   :  { %1829 = vmatpush3.bf16.xpose.msra.mxu1 %v318_v45  ;;  %1830 = vmatprep.mubr.msk.bf16.mxu1 %vm2073_vm1, %v2072_v15 }
 0x29f   :  { %1840 = vmatprep.subr.bf16.mxu1 %v2072_v15 }
 0x2a5   :  { %1831 = vmatmul.mubr.msk.bf16.vlgmr.msra.gmra.mrb[8].mxu1 %vm188_vm2, %v311_v46 }
 0x2a6   :  { %1844 = vmatprep.mubr.msk.bf16.mxu1 %vm2073_vm1, %v2072_v15  ;;  %1841 = vmatpush3.bf16.msra.mxu1 %v1980_v44  ;;  %v1988_v44 = vld [vmem:[%s2577_s12 + $0x20] sm:$0xff]  }
 0x2a7   :  { %1842 = vmatprep.subr.bf16.mxu1 %v2072_v15 }
 0x370   :  { %v229_v47 = vpop.f32.mrb[4].mxu1 }
 0x371   :  { %v236_v49 = vmul.f32 0.25, %v229_v47  ;;  %v1820_v50 = vpop.f32.mrb[5].mxu1 }
 0x372   :  { %v232_v51 = vpop.f32.mrb[6].mxu1  ;;  %v1981_v50 = vld [vmem:[%s2572_s6 + $0x8] sm:$0xff]  }
 0x373   :  { %v237_v53 = vmul.f32 0.25, %v232_v51  ;;  %v1821_v54 = vpop.f32.mrb[7].mxu1  ;;  %v238_v55 = vadd.f32 %v236_v49, %v2249_v48  ;;  %1843 = vmatpush3.bf16.msra.mxu1 %v1981_v50 }
 0x374   :  { %1856 = vmatprep.subr.bf16.mxu1 %v2072_v15 }
 0x375   :  { %v240_v56 = vsel %vm188_vm2, %v238_v55, -inf  ;;  %v239_v57 = vadd.f32 %v237_v53, %v2254_v52 }
 0x376   :  { %241 = vmax.xlane.f32.xlu1 %v240_v56 }
 0x377   :  { %v243_v58 = vsel %vm188_vm2, %v239_v57, -inf }
 0x378   :  { %244 = vmax.xlane.f32.xlu0 %v243_v58  ;;  %v354_v59 = vpop.f32.mrb[8].mxu1 }
 0x379   :  { %v361_v60 = vmul.f32 0.25, %v354_v59  ;;  %v1832_v61 = vpop.f32.mrb[9].mxu1 }
 0x37a   :  { %v357_v62 = vpop.f32.mrb[10].mxu1 }
 0x37b   :  { %v362_v63 = vmul.f32 0.25, %v357_v62  ;;  %v1833_v0 = vpop.f32.mrb[11].mxu1  ;;  %v363_v1 = vadd.f32 %v361_v60, %v2249_v48 }
 0x37d   :  { %v365_v2 = vsel %vm188_vm2, %v363_v1, -inf  ;;  %v364_v3 = vadd.f32 %v362_v63, %v2254_v52  ;;  %v1656_v63 = vld [vmem:[%s2573_s7] ss:$0 sm:$0xff] }
 0x37e   :  { %366 = vmax.xlane.f32.xlu0 %v365_v2 }
 0x37f   :  { %v368_v4 = vsel %vm188_vm2, %v364_v3, -inf }
 0x382   :  { %369 = vmax.xlane.f32.xlu0 %v368_v4 }
 0x403   :  { %v242_v5 = vpop.xlane.xlu1 %241 }
 0x404   :  { %v246_v6 = vsub.f32 %v238_v55, %v242_v5 }
 0x405   :  { %v245_v7 = vpop.xlane.xlu0 %244 }
 0x406   :  { %v248_v8 = vmul.f32 1.442695, %v246_v6  ;;  %v247_v9 = vsub.f32 %v239_v57, %v245_v7 }
 0x408   :  { %2014 = vpow2.f32 %v248_v8  ;;  %v250_v10 = vmul.f32 1.442695, %v247_v9 }
 0x40a   :  { %2016 = vpow2.f32 %v250_v10 }
 0x40b   :  { %v367_v11 = vpop.xlane.xlu0 %366 }
 0x40c   :  { %v371_v12 = vsub.f32 %v363_v1, %v367_v11 }
 0x40e   :  { %v373_v13 = vmul.f32 1.442695, %v371_v12 }
 0x40f   :  { %v370_v14 = vpop.xlane.xlu0 %369 }
 0x410   :  { %2018 = vpow2.f32 %v373_v13  ;;  %v372_v16 = vsub.f32 %v364_v3, %v370_v14 }
 0x412   :  { %v2015_v17 = vpop.eup %2014  ;;  %v375_v18 = vmul.f32 1.442695, %v372_v16 }
 0x413   :  { %v252_v19 = vsel %vm188_vm2, %v2015_v17, 0.0 }
 0x414   :  { %v2017_v20 = vpop.eup %2016  ;;  %2020 = vpow2.f32 %v375_v18  ;;  %253 = vadd.xlane.f32.xlu1 %v252_v19 }
 0x415   :  { %v255_v21 = vsel %vm188_vm2, %v2017_v20, 0.0 }
 0x416   :  { %256 = vadd.xlane.f32.xlu0 %v255_v21 }
 0x41a   :  { %v2019_v22 = vpop.eup %2018 }
 0x41b   :  { %v377_v23 = vsel %vm188_vm2, %v2019_v22, 0.0 }
 0x41c   :  { %378 = vadd.xlane.f32.xlu1 %v377_v23 }
 0x41e   :  { %v2021_v24 = vpop.eup %2020 }
 0x41f   :  { %v380_v25 = vsel %vm188_vm2, %v2021_v24, 0.0 }
 0x420   :  { %381 = vadd.xlane.f32.xlu0 %v380_v25 }
 0x42d   :  { %263 = vrot.lane.b32.xlu1 %v2227_v41, %s2077_s1 }
 0x436   :  { %388 = vrot.lane.b32.xlu0 %v2227_v41, %s2078_s30 }
 0x4a1   :  { %v254_v26 = vpop.xlane.xlu1 %253 }
 0x4a2   :  { %2022 = vrcp.f32 %v254_v26 }
 0x4a3   :  { %v257_v27 = vpop.xlane.xlu0 %256 }
 0x4a4   :  { %2024 = vrcp.f32 %v257_v27 }
 0x4a9   :  { %v379_v28 = vpop.xlane.xlu1 %378 }
 0x4aa   :  { %2026 = vrcp.f32 %v379_v28  ;;  %v1660_v28 = vld [vmem:[%s2575_s8] ss:$0 sm:$0xff] }
 0x4ac   :  { %v2023_v29 = vpop.eup %2022 }
 0x4ad   :  { %v264_v30 = vpop.permute.xlu1 %263  ;;  %v382_v33 = vpop.xlane.xlu0 %381  ;;  %v260_v35 = vmul.f32 %v2023_v29, %v2015_v17 }
 0x4ae   :  { %v2025_v34 = vpop.eup %2024  ;;  %2028 = vrcp.f32 %v382_v33  ;;  %1823 = vmatpush3.bf16.msra.mxu0 %v264_v30 }
 0x4af   :  { %1834 = vmatprep.subr.bf16.mxu0 %v2072_v15  ;;  %v261_v36 = vmul.f32 %v2025_v34, %v2017_v20  ;;  %v1983_v20 = vld [vmem:[%s2574_s10 + $0x8] sm:$0xff]  }
 0x4b1   :  { %v389_v37 = vpop.permute.xlu0 %388  ;;  %v262_v38 = vpack.c.bf16 %v261_v36, %v260_v35  ;;  %v1661_v35 = vld [vmem:[%s2576_s9] ss:$0 sm:$0xff] }
 0x4b3   :  { %1825 = vmatmul.mubr.msk.bf16.vlgmr.msra.gmra.mrb[0].mxu0 %vm188_vm2, %v262_v38 }
 0x4b4   :  { %1835 = vmatpush3.bf16.msra.mxu0 %v389_v37  ;;  %1836 = vmatprep.mubr.msk.bf16.mxu0 %vm2073_vm1, %v2072_v15  ;;  %v2027_v39 = vpop.eup %2026 }
 0x4b5   :  { %1848 = vmatprep.subr.bf16.mxu0 %v2072_v15  ;;  %v385_v41 = vmul.f32 %v2027_v39, %v2019_v22 }
 0x4b8   :  { %v2029_v40 = vpop.eup %2028 }
 0x4b9   :  { %v386_v42 = vmul.f32 %v2029_v40, %v2021_v24  ;;  %v1984_v40 = vld [vmem:[%s2577_s12] sm:$0xff]  }
 0x4bb   :  { %v387_v43 = vpack.c.bf16 %v386_v42, %v385_v41  ;;  %v1985_v41 = vld [vmem:[%s2577_s12 + $0x8] sm:$0xff]   ;;  %v1986_v42 = vld [vmem:[%s2577_s12 + $0x10] sm:$0xff]  }
 0x4bd   :  { %1837 = vmatmul.mubr.msk.bf16.vlgmr.msra.gmra.mrb[4].mxu0 %vm188_vm2, %v387_v43  ;;  %v1987_v43 = vld [vmem:[%s2577_s12 + $0x18] sm:$0xff]  }
 0x4be   :  { %1852 = vmatprep.mubr.msk.bf16.mxu0 %vm2073_vm1, %v2072_v15 }
 0x586   :  { %v303_v45 = vpop.f32.mrb[0].mxu0 }
 0x587   :  { %v1826_v46 = vpop.f32.mrb[1].mxu0 }
 0x588   :  { %v306_v47 = vpop.f32.mrb[2].mxu0  ;;  %v1990_v46 = vld [vmem:[%s2577_s12 + $0x30] sm:$0xff]  }
 0x589   :  { %v1827_v49 = vpop.f32.mrb[3].mxu0 }
 0x58a   :  { %v1662_v49 = vld [vmem:[%s2578_s11] ss:$0 sm:$0xff] }
 0x590   :  { %v428_v51 = vpop.f32.mrb[4].mxu0 }
 0x591   :  { %v1838_v53 = vpop.f32.mrb[5].mxu0 }
 0x592   :  { %v431_v54 = vpop.f32.mrb[6].mxu0 }
 0x593   :  { %v1968_v55 = vpack.i.bf16 %v431_v54, %v428_v51  ;;  %v1839_v56 = vpop.f32.mrb[7].mxu0 }
 0x595   :  { %1969 = vrot.lane.b32.xlu1 %v1968_v55, %s2079_s23 }
 0x607   :  { %v1970_v57 = vpop.permute.xlu1 %1969 }
 0x608   :  { %v1972_v58 = vunpack.i.h.bf16 %v1970_v57  ;;  %v1971_v59 = vunpack.i.l.bf16 %v1970_v57 }
 0x60a   :  { %v444_v60 = vsel %vm188_vm2, %v306_v47, %v1972_v58  ;;  %v443_v61 = vsel %vm188_vm2, %v303_v45, %v1971_v59  ;;  %v1989_v45 = vld [vmem:[%s2577_s12 + $0x28] sm:$0xff]   ;;  %v1991_v47 = vld [vmem:[%s2577_s12 + $0x38] sm:$0xff]  }
 0x60b   :  { %v445_v62 = vpack.c.bf16 %v444_v60, %v443_v61 }
 0x60d   :  { %1845 = vmatmul.mubr.msk.bf16.vlgmr.msra.gmra.mrb[12].mxu1 %vm70_vm0, %v445_v62 }
 0x60e   :  { %1872 = vmatprep.mubr.msk.bf16.mxu1 %vm2073_vm1, %v2072_v15  ;;  %1857 = vmatpush3.bf16.msra.mxu1 %v1984_v40 }
 0x60f   :  { %1858 = vmatprep.subr.bf16.mxu1 %v2072_v15 }
 0x612   :  { %1859 = vmatpush3.bf16.msra.mxu1 %v1985_v41 }
 0x613   :  { %1860 = vmatprep.subr.bf16.mxu1 %v2072_v15 }
 0x616   :  { %1861 = vmatpush3.bf16.msra.mxu1 %v1986_v42 }
 0x617   :  { %1862 = vmatprep.subr.bf16.mxu1 %v2072_v15 }
 0x61a   :  { %1863 = vmatpush3.bf16.msra.mxu1 %v1987_v43  ;;  %v1675_v43 = vld [vmem:[%s2580_s14] ss:$0 sm:$0xff] }
 0x61b   :  { %1864 = vmatprep.subr.bf16.mxu1 %v2072_v15 }
 0x61e   :  { %1865 = vmatpush3.bf16.msra.mxu1 %v1988_v44 }
 0x61f   :  { %1866 = vmatprep.subr.bf16.mxu1 %v2072_v15 }
 0x622   :  { %1867 = vmatpush3.bf16.msra.mxu1 %v1989_v45 }
 0x623   :  { %1868 = vmatprep.subr.bf16.mxu1 %v2072_v15 }
 0x626   :  { %1869 = vmatpush3.bf16.msra.mxu1 %v1990_v46 }
 0x627   :  { %1870 = vmatprep.subr.bf16.mxu1 %v2072_v15 }
 0x62a   :  { %1871 = vmatpush3.bf16.msra.mxu1 %v1991_v47 }
 0x62b   :  { %1902 = vmatprep.subr.bf16.mxu1 %v2072_v15 }
 0x6e0   :  { %v506_v0 = vpop.f32.mrb[12].mxu1 }
 0x6e1   :  { %v507_v1 = vadd.f32 %v1656_v63, %v506_v0  ;;  %v1846_v2 = vpop.f32.mrb[13].mxu1 }
 0x6e2   :  { %v509_v3 = vpop.f32.mrb[14].mxu1 }
 0x6e3   :  { %v510_v4 = vadd.f32 %v1656_v63, %v509_v3  ;;  %v1847_v5 = vpop.f32.mrb[15].mxu1  ;;  %v513_v6 = vadd.f32 %v507_v1, %v2215_v31 }
 0x6e5   :  { %v517_v7 = vsel %vm70_vm0, %v513_v6, 0.0  ;;  %v514_v8 = vadd.f32 %v510_v4, %v2217_v32  ;;  %v1982_v32 = vld [vmem:[%s2574_s10] sm:$0xff]  }
 0x6e6   :  { %518 = vadd.xlane.f32.xlu1 %v517_v7  ;;  %1849 = vmatpush3.bf16.msra.mxu0 %v1982_v32 }
 0x6e7   :  { %v520_v9 = vsel %vm70_vm0, %v514_v8, 0.0  ;;  %1850 = vmatprep.subr.bf16.mxu0 %v2072_v15 }
 0x6e8   :  { %521 = vadd.xlane.f32.xlu0 %v520_v9 }
 0x6ea   :  { %1851 = vmatpush3.bf16.msra.mxu0 %v1983_v20 }
 0x6eb   :  { %1876 = vmatprep.subr.bf16.mxu0 %v2072_v15 }
 0x773   :  { %v519_v10 = vpop.xlane.xlu1 %518 }
 0x774   :  { %v523_v11 = vmul.f32 0.03125, %v519_v10 }
 0x775   :  { %v522_v12 = vpop.xlane.xlu0 %521 }
 0x776   :  { %v525_v13 = vsub.f32 %v513_v6, %v523_v11  ;;  %v524_v14 = vmul.f32 0.03125, %v522_v12  ;;  %v1666_v12 = vld [vmem:[%s2579_s13] ss:$0 sm:$0xff] }
 0x778   :  { %v526_v16 = vsub.f32 %v514_v8, %v524_v14  ;;  %v527_v17 = vmul.f32 %v525_v13, %v525_v13 }
 0x77a   :  { %v529_v18 = vsel %vm70_vm0, %v527_v17, 0.0  ;;  %v528_v19 = vmul.f32 %v526_v16, %v526_v16 }
 0x77b   :  { %530 = vadd.xlane.f32.xlu0 %v529_v18 }
 0x77c   :  { %v532_v31 = vsel %vm70_vm0, %v528_v19, 0.0 }
 0x77d   :  { %533 = vadd.xlane.f32.xlu1 %v532_v31 }
 0x808   :  { %v531_v21 = vpop.xlane.xlu0 %530 }
 0x809   :  { %v535_v22 = vmul.f32 0.03125, %v531_v21 }
 0x80a   :  { %v534_v23 = vpop.xlane.xlu1 %533 }
 0x80b   :  { %v537_v24 = vadd.f32 1e-05, %v535_v22  ;;  %v536_v25 = vmul.f32 0.03125, %v534_v23 }
 0x80d   :  { %2030 = vrsqrt.f32 %v537_v24  ;;  %v538_v26 = vadd.f32 1e-05, %v536_v25 }
 0x80f   :  { %2032 = vrsqrt.f32 %v538_v26 }
 0x817   :  { %v2031_v27 = vpop.eup %2030 }
 0x818   :  { %v541_v29 = vmul.f32 %v2031_v27, %v525_v13 }
 0x819   :  { %v2033_v30 = vpop.eup %2032 }
 0x81a   :  { %v549_v33 = vmul.f32 %v1660_v28, %v541_v29  ;;  %v542_v34 = vmul.f32 %v2033_v30, %v526_v16 }
 0x81c   :  { %v550_v36 = vmul.f32 %v1660_v28, %v542_v34  ;;  %v2317_v37 = vadd.f32 %v1661_v35, %v549_v33  ;;  %v1992_v34 = vld [vmem:[%s2596_s26 + $0x10] sm:$0xff]  }
 0x81e   :  { %v2319_v38 = vadd.f32 %v1661_v35, %v550_v36  ;;  %v1993_v35 = vld [vmem:[%s2596_s26 + $0x18] sm:$0xff]  }
 0x820   :  { %v559_v39 = vpack.c.bf16 %v2319_v38, %v2317_v37 }
 0x822   :  { %1853 = vmatmul.mubr.msk.bf16.vlgmr.msra.gmra.mrb[8].mxu0 %vm70_vm0, %v559_v39 }
 0x823   :  { %1880 = vmatprep.mubr.msk.bf16.mxu0 %vm2073_vm1, %v2072_v15  ;;  %1877 = vmatpush3.bf16.msra.mxu0 %v1992_v34 }
 0x824   :  { %1878 = vmatprep.subr.bf16.mxu0 %v2072_v15 }
 0x827   :  { %1879 = vmatpush3.bf16.msra.mxu0 %v1993_v35 }
 0x828   :  { %1884 = vmatprep.subr.bf16.mxu0 %v2072_v15 }
 0x8f5   :  { %v620_v50 = vpop.f32.mrb[8].mxu0 }
 0x8f6   :  { %v621_v51 = vadd.f32 %v1662_v49, %v620_v50  ;;  %v1854_v53 = vpop.f32.mrb[9].mxu0 }
 0x8f7   :  { %v623_v54 = vpop.f32.mrb[10].mxu0 }
 0x8f8   :  { %v629_v55 = vmul.f32 0.044715, %v621_v51  ;;  %v624_v56 = vadd.f32 %v1662_v49, %v623_v54  ;;  %v1855_v57 = vpop.f32.mrb[11].mxu0  ;;  %v627_v6 = vmul.f32 0.5, %v621_v51  ;;  %v1676_v49 = vld [vmem:[%s2581_s15] ss:$0 sm:$0xff] }
 0x8fa   :  { %v631_v58 = vmul.f32 %v629_v55, %v621_v51  ;;  %v630_v59 = vmul.f32 0.044715, %v624_v56  ;;  %v628_v7 = vmul.f32 0.5, %v624_v56  ;;  %v1682_v55 = vld [vmem:[%s2599_s24 + $0x1] ss:$0 sm:$0xff] }
 0x8fc   :  { %v633_v60 = vmul.f32 %v631_v58, %v621_v51  ;;  %v632_v61 = vmul.f32 %v630_v59, %v624_v56 }
 0x8fe   :  { %v635_v62 = vadd.f32 %v633_v60, %v621_v51  ;;  %v634_v63 = vmul.f32 %v632_v61, %v624_v56 }
 0x900   :  { %v637_v0 = vmul.f32 0.7978846, %v635_v62  ;;  %v636_v1 = vadd.f32 %v634_v63, %v624_v56 }
 0x902   :  { %2034 = vtanh.f32 %v637_v0  ;;  %v638_v2 = vmul.f32 0.7978846, %v636_v1 }
 0x904   :  { %2036 = vtanh.f32 %v638_v2 }
 0x90c   :  { %v2035_v3 = vpop.eup %2034 }
 0x90d   :  { %v641_v4 = vadd.f32 1.0, %v2035_v3 }
 0x90e   :  { %v2037_v5 = vpop.eup %2036 }
 0x90f   :  { %v642_v8 = vadd.f32 1.0, %v2037_v5  ;;  %v643_v9 = vmul.f32 %v641_v4, %v627_v6 }
 0x911   :  { %v644_v10 = vmul.f32 %v642_v8, %v628_v7 }
 0x913   :  { %v645_v11 = vpack.c.bf16 %v644_v10, %v643_v9 }
 0x915   :  { %1873 = vmatmul.mubr.bf16.vlgmr.msra.gmra.mrb[16].mxu1 %v645_v11 }
 0x916   :  { %1904 = vmatprep.mubr.msk.bf16.mxu1 %vm2073_vm1, %v2072_v15 }
 0x9e8   :  { %v751_v13 = vpop.f32.mrb[16].mxu1 }
 0x9e9   :  { %v752_v14 = vadd.f32 %v1666_v12, %v751_v13  ;;  %v1874_v16 = vpop.f32.mrb[17].mxu1 }
 0x9ea   :  { %v754_v17 = vpop.f32.mrb[18].mxu1 }
 0x9eb   :  { %v755_v18 = vadd.f32 %v1666_v12, %v754_v17  ;;  %v1875_v19 = vpop.f32.mrb[19].mxu1  ;;  %v758_v31 = vadd.f32 %v752_v14, %v2317_v37 }
 0x9ed   :  { %v762_v32 = vsel %vm70_vm0, %v758_v31, 0.0  ;;  %v759_v20 = vadd.f32 %v755_v18, %v2319_v38 }
 0x9ee   :  { %763 = vadd.xlane.f32.xlu0 %v762_v32 }
 0x9ef   :  { %v765_v21 = vsel %vm70_vm0, %v759_v20, 0.0 }
 0x9f0   :  { %766 = vadd.xlane.f32.xlu1 %v765_v21 }
 0xa7b   :  { %v764_v22 = vpop.xlane.xlu0 %763 }
 0xa7c   :  { %v768_v23 = vmul.f32 0.03125, %v764_v22 }
 0xa7d   :  { %v767_v24 = vpop.xlane.xlu1 %766 }
 0xa7e   :  { %v770_v25 = vsub.f32 %v758_v31, %v768_v23  ;;  %v769_v26 = vmul.f32 0.03125, %v767_v24 }
 0xa80   :  { %v771_v27 = vsub.f32 %v759_v20, %v769_v26  ;;  %v772_v28 = vmul.f32 %v770_v25, %v770_v25 }
 0xa82   :  { %v774_v29 = vsel %vm70_vm0, %v772_v28, 0.0  ;;  %v773_v30 = vmul.f32 %v771_v27, %v771_v27 }
 0xa83   :  { %775 = vadd.xlane.f32.xlu0 %v774_v29 }
 0xa84   :  { %v777_v33 = vsel %vm70_vm0, %v773_v30, 0.0 }
 0xa85   :  { %778 = vadd.xlane.f32.xlu1 %v777_v33 }
 0xb10   :  { %v776_v36 = vpop.xlane.xlu0 %775 }
 0xb11   :  { %v780_v37 = vmul.f32 0.03125, %v776_v36 }
 0xb12   :  { %v779_v38 = vpop.xlane.xlu1 %778 }
 0xb13   :  { %v782_v39 = vadd.f32 1e-05, %v780_v37  ;;  %v781_v40 = vmul.f32 0.03125, %v779_v38 }
 0xb15   :  { %2038 = vrsqrt.f32 %v782_v39  ;;  %v783_v41 = vadd.f32 1e-05, %v781_v40 }
 0xb17   :  { %2040 = vrsqrt.f32 %v783_v41 }
 0xb1f   :  { %v2039_v42 = vpop.eup %2038 }
 0xb20   :  { %v786_v44 = vmul.f32 %v2039_v42, %v770_v25 }
 0xb21   :  { %v2041_v45 = vpop.eup %2040 }
 0xb22   :  { %v794_v46 = vmul.f32 %v1675_v43, %v786_v44  ;;  %v787_v47 = vmul.f32 %v2041_v45, %v771_v27 }
 0xb24   :  { %v795_v50 = vmul.f32 %v1675_v43, %v787_v47  ;;  %v2386_v51 = vadd.f32 %v1676_v49, %v794_v46 }
 0xb26   :  { %v2388_v53 = vadd.f32 %v1676_v49, %v795_v50 }
 0xb28   :  { %v804_v54 = vpack.c.bf16 %v2388_v53, %v2386_v51 }
 0xb2a   :  { %1881 = vmatmul.mubr.msk.bf16.vlgmr.msra.gmra.mrb[12].mxu0 %vm70_vm0, %v804_v54 }
 0xb2b   :  { %1886 = vmatprep.mubr.msk.bf16.mxu0 %vm2073_vm1, %v2072_v15 }
 0xbfd   :  { %v867_v56 = vpop.f32.mrb[12].mxu0 }
 0xbfe   :  { %v1882_v57 = vpop.f32.mrb[13].mxu0  ;;  %v868_v59 = vadd.f32 %v1682_v55, %v867_v56 }
 0xbff   :  { %v870_v58 = vpop.f32.mrb[14].mxu0 }
 0xc00   :  { %v871_v60 = vadd.f32 %v1682_v55, %v870_v58  ;;  %v1883_v61 = vpop.f32.mrb[15].mxu0 }
 0xc02   :  { %v2398_v62 = vpack.c.bf16 %v871_v60, %v868_v59 }
 0xc04   :  { %876 = vrot.lane.b32.xlu0 %v2398_v62, %s2075_s25 }
 0xc08   :  { %1001 = vrot.lane.b32.xlu0 %v2398_v62, %s2074_s2 }
 0xc0c   :  { %999 = vrot.lane.b32.xlu0 %v2398_v62, %s2076_s3 }
 0xc76   :  { %v877_v63 = vpop.permute.xlu0 %876 }
 0xc77   :  { %v882_v0 = vsel %vm188_vm2, %v877_v63, 0 }
 0xc78   :  { %1885 = vmatpush3.bf16.xpose.msra.mxu0 %v882_v0 }
 0xc79   :  { %1890 = vmatprep.subr.bf16.mxu0 %v2072_v15 }
 0xc7a   :  { %v1002_v27 = vpop.permute.xlu0 %1001 }
 0xc7b   :  { %v1007_v29 = vsel %vm188_vm2, %v1002_v27, 0 }
 0xc7e   :  { %v1000_v30 = vpop.permute.xlu0 %999 }
 0xc7f   :  { %1887 = vmatmul.mubr.msk.bf16.vlgmr.msra.gmra.mrb[16].mxu0 %vm188_vm2, %v2398_v62 }
 0xc80   :  { %1892 = vmatprep.mubr.msk.bf16.mxu0 %vm2073_vm1, %v2072_v15 }
 0xd52   :  { %v918_v1 = vpop.f32.mrb[16].mxu0 }
 0xd53   :  { %v925_v2 = vmul.f32 0.25, %v918_v1  ;;  %v1888_v3 = vpop.f32.mrb[17].mxu0 }
 0xd54   :  { %v921_v4 = vpop.f32.mrb[18].mxu0 }
 0xd55   :  { %v926_v5 = vmul.f32 0.25, %v921_v4  ;;  %v1889_v6 = vpop.f32.mrb[19].mxu0  ;;  %v927_v7 = vadd.f32 %v925_v2, %v2249_v48  ;;  %v1995_v4 = vld [vmem:[%s2572_s6 + $0x18] sm:$0xff]  }
 0xd57   :  { %v929_v8 = vsel %vm188_vm2, %v927_v7, -inf  ;;  %v928_v9 = vadd.f32 %v926_v5, %v2254_v52 }
 0xd58   :  { %930 = vmax.xlane.f32.xlu1 %v929_v8 }
 0xd59   :  { %v932_v10 = vsel %vm188_vm2, %v928_v9, -inf }
 0xd5c   :  { %933 = vmax.xlane.f32.xlu1 %v932_v10 }
 0xde5   :  { %v931_v11 = vpop.xlane.xlu1 %930 }
 0xde6   :  { %v935_v12 = vsub.f32 %v927_v7, %v931_v11 }
 0xde8   :  { %v937_v13 = vmul.f32 1.442695, %v935_v12 }
 0xde9   :  { %v934_v14 = vpop.xlane.xlu1 %933 }
 0xdea   :  { %2042 = vpow2.f32 %v937_v13  ;;  %v936_v16 = vsub.f32 %v928_v9, %v934_v14 }
 0xdec   :  { %v939_v17 = vmul.f32 1.442695, %v936_v16 }
 0xdee   :  { %2044 = vpow2.f32 %v939_v17  ;;  %v1695_v17 = vld [vmem:[%s2573_s7 + $0x1] ss:$0 sm:$0xff] }
 0xdf4   :  { %v2043_v18 = vpop.eup %2042 }
 0xdf5   :  { %v941_v19 = vsel %vm188_vm2, %v2043_v18, 0.0 }
 0xdf6   :  { %942 = vadd.xlane.f32.xlu1 %v941_v19 }
 0xdf8   :  { %v2045_v31 = vpop.eup %2044 }
 0xdf9   :  { %v944_v32 = vsel %vm188_vm2, %v2045_v31, 0.0 }
 0xdfa   :  { %945 = vadd.xlane.f32.xlu1 %v944_v32 }
 0xe0b   :  { %952 = vrot.lane.b32.xlu1 %v2398_v62, %s2077_s1 }
 0xe83   :  { %v943_v20 = vpop.xlane.xlu1 %942 }
 0xe84   :  { %2046 = vrcp.f32 %v943_v20 }
 0xe87   :  { %v946_v21 = vpop.xlane.xlu1 %945 }
 0xe88   :  { %2048 = vrcp.f32 %v946_v21 }
 0xe8b   :  { %v953_v22 = vpop.permute.xlu1 %952 }
 0xe8c   :  { %1891 = vmatpush3.bf16.msra.mxu0 %v953_v22 }
 0xe8d   :  { %1896 = vmatprep.subr.bf16.mxu0 %v2072_v15 }
 0xe8e   :  { %v2047_v23 = vpop.eup %2046 }
 0xe8f   :  { %v949_v25 = vmul.f32 %v2047_v23, %v2043_v18 }
 0xe92   :  { %v2049_v24 = vpop.eup %2048 }
 0xe93   :  { %v950_v26 = vmul.f32 %v2049_v24, %v2045_v31 }
 0xe95   :  { %v951_v28 = vpack.c.bf16 %v950_v26, %v949_v25 }
 0xe97   :  { %1893 = vmatmul.mubr.msk.bf16.vlgmr.msra.gmra.mrb[20].mxu0 %vm188_vm2, %v951_v28 }
 0xe98   :  { %1897 = vmatpush3.bf16.xpose.msra.mxu0 %v1007_v29  ;;  %1898 = vmatprep.mubr.msk.bf16.mxu0 %vm2073_vm1, %v2072_v15 }
 0xe99   :  { %1908 = vmatprep.subr.bf16.mxu0 %v2072_v15 }
 0xe9f   :  { %1899 = vmatmul.mubr.msk.bf16.vlgmr.msra.gmra.mrb[24].mxu0 %vm188_vm2, %v1000_v30 }
 0xea0   :  { %1912 = vmatprep.mubr.msk.bf16.mxu0 %vm2073_vm1, %v2072_v15 }
 0xf6a   :  { %v992_v33 = vpop.f32.mrb[20].mxu0 }
 0xf6b   :  { %v1894_v34 = vpop.f32.mrb[21].mxu0 }
 0xf6c   :  { %v995_v35 = vpop.f32.mrb[22].mxu0 }
 0xf6d   :  { %v1895_v36 = vpop.f32.mrb[23].mxu0 }
 0xf72   :  { %v1043_v37 = vpop.f32.mrb[24].mxu0 }
 0xf73   :  { %v1050_v38 = vmul.f32 0.25, %v1043_v37  ;;  %v1900_v39 = vpop.f32.mrb[25].mxu0  ;;  %v1997_v37 = vld [vmem:[%s2574_s10 + $0x18] sm:$0xff]  }
 0xf74   :  { %v1046_v40 = vpop.f32.mrb[26].mxu0 }
 0xf75   :  { %v1051_v41 = vmul.f32 0.25, %v1046_v40  ;;  %v1901_v42 = vpop.f32.mrb[27].mxu0  ;;  %v1052_v43 = vadd.f32 %v1050_v38, %v2249_v48 }
 0xf77   :  { %v1054_v44 = vsel %vm188_vm2, %v1052_v43, -inf  ;;  %v1053_v45 = vadd.f32 %v1051_v41, %v2254_v52 }
 0xf78   :  { %1055 = vmax.xlane.f32.xlu0 %v1054_v44 }
 0xf79   :  { %v1057_v46 = vsel %vm188_vm2, %v1053_v45, -inf }
 0xf7a   :  { %1058 = vmax.xlane.f32.xlu1 %v1057_v46 }
0x1005   :  { %v1056_v47 = vpop.xlane.xlu0 %1055 }
0x1006   :  { %v1060_v49 = vsub.f32 %v1052_v43, %v1056_v47 }
0x1007   :  { %v1059_v50 = vpop.xlane.xlu1 %1058 }
0x1008   :  { %v1062_v54 = vmul.f32 1.442695, %v1060_v49  ;;  %v1061_v55 = vsub.f32 %v1053_v45, %v1059_v50  ;;  %v1701_v45 = vld [vmem:[%s2575_s8 + $0x1] ss:$0 sm:$0xff] }
0x100a   :  { %2050 = vpow2.f32 %v1062_v54  ;;  %v1064_v56 = vmul.f32 1.442695, %v1061_v55  ;;  %v1702_v54 = vld [vmem:[%s2576_s9 + $0x1] ss:$0 sm:$0xff] }
0x100c   :  { %2052 = vpow2.f32 %v1064_v56 }
0x1014   :  { %v2051_v57 = vpop.eup %2050 }
0x1015   :  { %v1066_v58 = vsel %vm188_vm2, %v2051_v57, 0.0 }
0x1016   :  { %v2053_v48 = vpop.eup %2052  ;;  %1067 = vadd.xlane.f32.xlu0 %v1066_v58 }
0x1017   :  { %v1069_v59 = vsel %vm188_vm2, %v2053_v48, 0.0 }
0x101a   :  { %1070 = vadd.xlane.f32.xlu0 %v1069_v59  ;;  %v1999_v59 = vld [vmem:[%s2577_s12 + $0x48] sm:$0xff]  }
0x1030   :  { %1077 = vrot.lane.b32.xlu0 %v2398_v62, %s2078_s30  ;;  %v1994_v62 = vld [vmem:[%s2572_s6 + $0x10] sm:$0xff]  }
0x1031   :  { %1909 = vmatpush3.bf16.msra.mxu0 %v1994_v62 }
0x1032   :  { %1910 = vmatprep.subr.bf16.mxu0 %v2072_v15 }
0x1035   :  { %1911 = vmatpush3.bf16.msra.mxu0 %v1995_v4 }
0x1036   :  { %1924 = vmatprep.subr.bf16.mxu0 %v2072_v15 }
0x10a3   :  { %v1068_v52 = vpop.xlane.xlu0 %1067 }
0x10a4   :  { %2054 = vrcp.f32 %v1068_v52  ;;  %v2000_v52 = vld [vmem:[%s2577_s12 + $0x50] sm:$0xff]  }
0x10a7   :  { %v1071_v60 = vpop.xlane.xlu0 %1070 }
0x10a8   :  { %2056 = vrcp.f32 %v1071_v60  ;;  %v2001_v60 = vld [vmem:[%s2577_s12 + $0x58] sm:$0xff]  }
0x10ab   :  { %v1078_v61 = vpop.permute.xlu0 %1077 }
0x10ac   :  { %1903 = vmatpush3.bf16.msra.mxu1 %v1078_v61  ;;  %v2002_v61 = vld [vmem:[%s2577_s12 + $0x60] sm:$0xff]  }
0x10ad   :  { %1916 = vmatprep.subr.bf16.mxu1 %v2072_v15 }
0x10ae   :  { %v2055_v63 = vpop.eup %2054 }
0x10af   :  { %v1074_v1 = vmul.f32 %v2055_v63, %v2051_v57  ;;  %v2003_v63 = vld [vmem:[%s2577_s12 + $0x68] sm:$0xff]  }
0x10b2   :  { %v2057_v0 = vpop.eup %2056 }
0x10b3   :  { %v1075_v2 = vmul.f32 %v2057_v0, %v2053_v48  ;;  %v1998_v48 = vld [vmem:[%s2577_s12 + $0x40] sm:$0xff]   ;;  %v2004_v0 = vld [vmem:[%s2577_s12 + $0x70] sm:$0xff]  }
0x10b5   :  { %v1076_v3 = vpack.c.bf16 %v1075_v2, %v1074_v1  ;;  %v2005_v1 = vld [vmem:[%s2577_s12 + $0x78] sm:$0xff]   ;;  %v1708_v2 = vld [vmem:[%s2578_s11 + $0x1] ss:$0 sm:$0xff] }
0x10b7   :  { %1905 = vmatmul.mubr.msk.bf16.vlgmr.msra.gmra.mrb[20].mxu1 %vm188_vm2, %v1076_v3 }
0x10b8   :  { %1920 = vmatprep.mubr.msk.bf16.mxu1 %vm2073_vm1, %v2072_v15 }
0x118a   :  { %v1117_v5 = vpop.f32.mrb[20].mxu1 }
0x118b   :  { %v1906_v6 = vpop.f32.mrb[21].mxu1 }
0x118c   :  { %v1120_v7 = vpop.f32.mrb[22].mxu1 }
0x118d   :  { %v1973_v8 = vpack.i.bf16 %v1120_v7, %v1117_v5  ;;  %v1907_v9 = vpop.f32.mrb[23].mxu1 }
0x118f   :  { %1974 = vrot.lane.b32.xlu1 %v1973_v8, %s2079_s23 }
0x1201   :  { %v1975_v10 = vpop.permute.xlu1 %1974 }
0x1202   :  { %v1977_v11 = vunpack.i.h.bf16 %v1975_v10  ;;  %v1976_v12 = vunpack.i.l.bf16 %v1975_v10 }
0x1204   :  { %v1133_v13 = vsel %vm188_vm2, %v995_v35, %v1977_v11  ;;  %v1132_v14 = vsel %vm188_vm2, %v992_v33, %v1976_v12 }
0x1205   :  { %v1134_v16 = vpack.c.bf16 %v1133_v13, %v1132_v14 }
0x1207   :  { %1913 = vmatmul.mubr.msk.bf16.vlgmr.msra.gmra.mrb[28].mxu0 %vm70_vm0, %v1134_v16 }
0x1208   :  { %1940 = vmatprep.mubr.msk.bf16.mxu0 %vm2073_vm1, %v2072_v15  ;;  %1925 = vmatpush3.bf16.msra.mxu0 %v1998_v48 }
0x1209   :  { %1926 = vmatprep.subr.bf16.mxu0 %v2072_v15 }
0x120c   :  { %1927 = vmatpush3.bf16.msra.mxu0 %v1999_v59  ;;  %v1740_v59 = vld [vmem:[%s2580_s14 + $0x1] ss:$0 sm:$0xff] }
0x120d   :  { %1928 = vmatprep.subr.bf16.mxu0 %v2072_v15 }
0x1210   :  { %1929 = vmatpush3.bf16.msra.mxu0 %v2000_v52 }
0x1211   :  { %1930 = vmatprep.subr.bf16.mxu0 %v2072_v15 }
0x1214   :  { %1931 = vmatpush3.bf16.msra.mxu0 %v2001_v60 }
0x1215   :  { %1932 = vmatprep.subr.bf16.mxu0 %v2072_v15 }
0x1218   :  { %1933 = vmatpush3.bf16.msra.mxu0 %v2002_v61  ;;  %v1741_v61 = vld [vmem:[%s2581_s15 + $0x1] ss:$0 sm:$0xff] }
0x1219   :  { %1934 = vmatprep.subr.bf16.mxu0 %v2072_v15 }
0x121c   :  { %1935 = vmatpush3.bf16.msra.mxu0 %v2003_v63 }
0x121d   :  { %1936 = vmatprep.subr.bf16.mxu0 %v2072_v15 }
0x1220   :  { %1937 = vmatpush3.bf16.msra.mxu0 %v2004_v0 }
0x1221   :  { %1938 = vmatprep.subr.bf16.mxu0 %v2072_v15 }
0x1224   :  { %1939 = vmatpush3.bf16.msra.mxu0 %v2005_v1 }
0x12da   :  { %v1197_v18 = vpop.f32.mrb[28].mxu0 }
0x12db   :  { %v1198_v19 = vadd.f32 %v1695_v17, %v1197_v18  ;;  %v1914_v31 = vpop.f32.mrb[29].mxu0 }
0x12dc   :  { %v1200_v32 = vpop.f32.mrb[30].mxu0 }
0x12dd   :  { %v1201_v20 = vadd.f32 %v1695_v17, %v1200_v32  ;;  %v1915_v21 = vpop.f32.mrb[31].mxu0  ;;  %v1204_v22 = vadd.f32 %v1198_v19, %v2386_v51 }
0x12df   :  { %v1210_v23 = vsel %vm70_vm0, %v1204_v22, 0.0  ;;  %v1205_v24 = vadd.f32 %v1201_v20, %v2388_v53  ;;  %v1996_v53 = vld [vmem:[%s2574_s10 + $0x10] sm:$0xff]  }
0x12e0   :  { %1211 = vadd.xlane.f32.xlu1 %v1210_v23  ;;  %1917 = vmatpush3.bf16.msra.mxu1 %v1996_v53 }
0x12e1   :  { %v1213_v25 = vsel %vm70_vm0, %v1205_v24, 0.0  ;;  %1918 = vmatprep.subr.bf16.mxu1 %v2072_v15 }
0x12e2   :  { %1214 = vadd.xlane.f32.xlu0 %v1213_v25 }
0x12e4   :  { %1919 = vmatpush3.bf16.msra.mxu1 %v1997_v37 }
0x12e5   :  { %1944 = vmatprep.subr.bf16.mxu1 %v2072_v15 }
0x136d   :  { %v1212_v26 = vpop.xlane.xlu1 %1211 }
0x136e   :  { %v1216_v27 = vmul.f32 0.03125, %v1212_v26  ;;  %v1729_v26 = vld [vmem:[%s2579_s13 + $0x1] ss:$0 sm:$0xff] }
0x136f   :  { %v1215_v28 = vpop.xlane.xlu0 %1214 }
0x1370   :  { %v1218_v29 = vsub.f32 %v1204_v22, %v1216_v27  ;;  %v1217_v30 = vmul.f32 0.03125, %v1215_v28 }
0x1372   :  { %v1219_v33 = vsub.f32 %v1205_v24, %v1217_v30  ;;  %v1220_v34 = vmul.f32 %v1218_v29, %v1218_v29 }
0x1374   :  { %v1222_v35 = vsel %vm70_vm0, %v1220_v34, 0.0  ;;  %v1221_v36 = vmul.f32 %v1219_v33, %v1219_v33 }
0x1375   :  { %1223 = vadd.xlane.f32.xlu0 %v1222_v35 }
0x1376   :  { %v1225_v51 = vsel %vm70_vm0, %v1221_v36, 0.0 }
0x1377   :  { %1226 = vadd.xlane.f32.xlu1 %v1225_v51 }
0x1402   :  { %v1224_v38 = vpop.xlane.xlu0 %1223 }
0x1403   :  { %v1228_v39 = vmul.f32 0.03125, %v1224_v38 }
0x1404   :  { %v1227_v40 = vpop.xlane.xlu1 %1226 }
0x1405   :  { %v1230_v41 = vadd.f32 1e-05, %v1228_v39  ;;  %v1229_v42 = vmul.f32 0.03125, %v1227_v40 }
0x1407   :  { %2058 = vrsqrt.f32 %v1230_v41  ;;  %v1231_v43 = vadd.f32 1e-05, %v1229_v42 }
0x1409   :  { %2060 = vrsqrt.f32 %v1231_v43 }
0x1411   :  { %v2059_v44 = vpop.eup %2058 }
0x1412   :  { %v1234_v46 = vmul.f32 %v2059_v44, %v1218_v29 }
0x1413   :  { %v2061_v47 = vpop.eup %2060 }
0x1414   :  { %v1242_v49 = vmul.f32 %v1701_v45, %v1234_v46  ;;  %v1235_v50 = vmul.f32 %v2061_v47, %v1219_v33  ;;  %v2006_v47 = vld [vmem:[%s2582_s16] sm:$0xff]  }
0x1416   :  { %v1243_v55 = vmul.f32 %v1701_v45, %v1235_v50  ;;  %v2478_v56 = vadd.f32 %v1702_v54, %v1242_v49  ;;  %v2007_v49 = vld [vmem:[%s2582_s16 + $0x8] sm:$0xff]  }
0x1418   :  { %v2480_v57 = vadd.f32 %v1702_v54, %v1243_v55 }
0x141a   :  { %v1252_v58 = vpack.c.bf16 %v2480_v57, %v2478_v56 }
0x141c   :  { %1921 = vmatmul.mubr.msk.bf16.vlgmr.msra.gmra.mrb[24].mxu1 %vm70_vm0, %v1252_v58 }
0x141d   :  { %1948 = vmatprep.mubr.msk.bf16.mxu1 %vm2073_vm1, %v2072_v15  ;;  %1945 = vmatpush3.bf16.msra.mxu1 %v2006_v47 }
0x141e   :  { %1946 = vmatprep.subr.bf16.mxu1 %v2072_v15 }
0x1421   :  { %1947 = vmatpush3.bf16.msra.mxu1 %v2007_v49 }
0x1422   :  { %1952 = vmatprep.subr.bf16.mxu1 %v2072_v15 }
0x14ef   :  { %v1315_v3 = vpop.f32.mrb[24].mxu1 }
0x14f0   :  { %v1316_v62 = vadd.f32 %v1708_v2, %v1315_v3  ;;  %v1922_v4 = vpop.f32.mrb[25].mxu1 }
0x14f1   :  { %v1318_v5 = vpop.f32.mrb[26].mxu1 }
0x14f2   :  { %v1324_v6 = vmul.f32 0.044715, %v1316_v62  ;;  %v1319_v7 = vadd.f32 %v1708_v2, %v1318_v5  ;;  %v1923_v8 = vpop.f32.mrb[27].mxu1  ;;  %v1322_v20 = vmul.f32 0.5, %v1316_v62  ;;  %v2008_v5 = vld [vmem:[%s2583_s18] sm:$0xff]  }
0x14f4   :  { %v1326_v9 = vmul.f32 %v1324_v6, %v1316_v62  ;;  %v1325_v10 = vmul.f32 0.044715, %v1319_v7  ;;  %v1323_v21 = vmul.f32 0.5, %v1319_v7  ;;  %v2009_v6 = vld [vmem:[%s2583_s18 + $0x8] sm:$0xff]  }
0x14f6   :  { %v1328_v11 = vmul.f32 %v1326_v9, %v1316_v62  ;;  %v1327_v12 = vmul.f32 %v1325_v10, %v1319_v7 }
0x14f8   :  { %v1330_v13 = vadd.f32 %v1328_v11, %v1316_v62  ;;  %v1329_v14 = vmul.f32 %v1327_v12, %v1319_v7 }
0x14fa   :  { %v1332_v16 = vmul.f32 0.7978846, %v1330_v13  ;;  %v1331_v17 = vadd.f32 %v1329_v14, %v1319_v7  ;;  %v1742_v7 = vld [vmem:[%s2584_s17] ss:$0 sm:$0xff] }
0x14fc   :  { %2062 = vtanh.f32 %v1332_v16  ;;  %v1333_v18 = vmul.f32 0.7978846, %v1331_v17 }
0x14fe   :  { %2064 = vtanh.f32 %v1333_v18 }
0x1506   :  { %v2063_v19 = vpop.eup %2062 }
0x1507   :  { %v1336_v31 = vadd.f32 1.0, %v2063_v19 }
0x1508   :  { %v2065_v32 = vpop.eup %2064 }
0x1509   :  { %v1337_v22 = vadd.f32 1.0, %v2065_v32  ;;  %v1338_v23 = vmul.f32 %v1336_v31, %v1322_v20 }
0x150b   :  { %v1339_v24 = vmul.f32 %v1337_v22, %v1323_v21 }
0x150d   :  { %v1340_v25 = vpack.c.bf16 %v1339_v24, %v1338_v23 }
0x150f   :  { %1941 = vmatmul.mubr.bf16.vlgmr.msra.gmra.mrb[32].mxu0 %v1340_v25 }
0x15e2   :  { %v1448_v27 = vpop.f32.mrb[32].mxu0 }
0x15e3   :  { %v1449_v28 = vadd.f32 %v1729_v26, %v1448_v27  ;;  %v1942_v29 = vpop.f32.mrb[33].mxu0 }
0x15e4   :  { %v1451_v30 = vpop.f32.mrb[34].mxu0 }
0x15e5   :  { %v1452_v33 = vadd.f32 %v1729_v26, %v1451_v30  ;;  %v1943_v34 = vpop.f32.mrb[35].mxu0  ;;  %v1455_v35 = vadd.f32 %v1449_v28, %v2478_v56 }
0x15e7   :  { %v1461_v36 = vsel %vm70_vm0, %v1455_v35, 0.0  ;;  %v1456_v51 = vadd.f32 %v1452_v33, %v2480_v57 }
0x15e8   :  { %1462 = vadd.xlane.f32.xlu0 %v1461_v36 }
0x15e9   :  { %v1464_v53 = vsel %vm70_vm0, %v1456_v51, 0.0 }
0x15ea   :  { %1465 = vadd.xlane.f32.xlu1 %v1464_v53 }
0x1675   :  { %v1463_v37 = vpop.xlane.xlu0 %1462 }
0x1676   :  { %v1467_v38 = vmul.f32 0.03125, %v1463_v37 }
0x1677   :  { %v1466_v39 = vpop.xlane.xlu1 %1465 }
0x1678   :  { %v1469_v40 = vsub.f32 %v1455_v35, %v1467_v38  ;;  %v1468_v41 = vmul.f32 0.03125, %v1466_v39 }
0x167a   :  { %v1470_v42 = vsub.f32 %v1456_v51, %v1468_v41  ;;  %v1471_v43 = vmul.f32 %v1469_v40, %v1469_v40 }
0x167c   :  { %v1473_v44 = vsel %vm70_vm0, %v1471_v43, 0.0  ;;  %v1472_v45 = vmul.f32 %v1470_v42, %v1470_v42 }
0x167d   :  { %1474 = vadd.xlane.f32.xlu0 %v1473_v44 }
0x167e   :  { %v1476_v46 = vsel %vm70_vm0, %v1472_v45, 0.0 }
0x167f   :  { %1477 = vadd.xlane.f32.xlu1 %v1476_v46 }
0x170a   :  { %v1475_v50 = vpop.xlane.xlu0 %1474 }
0x170b   :  { %v1479_v54 = vmul.f32 0.03125, %v1475_v50 }
0x170c   :  { %v1478_v55 = vpop.xlane.xlu1 %1477 }
0x170d   :  { %v1481_v56 = vadd.f32 1e-05, %v1479_v54  ;;  %v1480_v57 = vmul.f32 0.03125, %v1478_v55 }
0x170f   :  { %2066 = vrsqrt.f32 %v1481_v56  ;;  %v1482_v58 = vadd.f32 1e-05, %v1480_v57 }
0x1711   :  { %2068 = vrsqrt.f32 %v1482_v58 }
0x1719   :  { %v2067_v48 = vpop.eup %2066 }
0x171a   :  { %v1485_v52 = vmul.f32 %v2067_v48, %v1469_v40 }
0x171b   :  { %v2069_v60 = vpop.eup %2068 }
0x171c   :  { %v1493_v63 = vmul.f32 %v1740_v59, %v1485_v52  ;;  %v1486_v0 = vmul.f32 %v2069_v60, %v1470_v42 }
0x171e   :  { %v1501_v1 = vadd.f32 %v1741_v61, %v1493_v63  ;;  %v1494_v2 = vmul.f32 %v1740_v59, %v1486_v0 }
0x1720   :  { %1503 = vst.msk [vmem:[#allocation2] sm:$0xff] %vm70_vm0, %v1501_v1  ;;  %v1502_v3 = vadd.f32 %v1741_v61, %v1494_v2 }
0x1722   :  { %1504 = vst.msk [vmem:[#allocation2 + $0x8] sm:$0xff] %vm70_vm0, %v1502_v3 }
0x1729   :  { %v1505_v62 = vld [vmem:[#allocation2] ss:$8 sm:$0x3] }
0x172a   :  { %v1506_v4 = vpack.c.bf16 %v1505_v62, %v1505_v62 }
0x172c   :  { %1949 = vmatmul.mubr.msk.bf16.vlgmr.msra.gmra.mrb[28].mxu1 %vm70_vm0, %v1506_v4 }
0x172d   :  { %1956 = vmatprep.mubr.msk.bf16.mxu1 %vm2073_vm1, %v2072_v15  ;;  %1953 = vmatpush3.bf16.msra.mxu1 %v2008_v5 }
0x172e   :  { %1954 = vmatprep.subr.bf16.mxu1 %v2072_v15  ;;  %v1746_v15 = vld [vmem:[%s2585_s19] ss:$0 sm:$0xff] }
0x1731   :  { %1955 = vmatpush3.bf16.msra.mxu1 %v2009_v6 }
0x17ff   :  { %v1567_v8 = vpop.f32.mrb[28].mxu1 }
0x1800   :  { %v1568_v9 = vadd.f32 %v1742_v7, %v1567_v8  ;;  %v1950_v10 = vpop.f32.mrb[29].mxu1 }
0x1801   :  { %v1570_v11 = vpop.f32.mrb[30].mxu1 }
0x1802   :  { %2070 = vtanh.f32 %v1568_v9  ;;  %v1951_v12 = vpop.f32.mrb[31].mxu1 }
0x180c   :  { %v2071_v13 = vpop.eup %2070 }
0x180d   :  { %v1574_v14 = vpack.c.bf16 %v2071_v13, %v2071_v13 }
0x180f   :  { %1957 = vmatmul.mubr.msk.bf16.vlgmr.msra.gmra.mrb[32].mxu1 %vm70_vm0, %v1574_v14 }
0x18e2   :  { %v1635_v16 = vpop.f32.mrb[32].mxu1 }
0x18e3   :  { %v1636_v17 = vadd.f32 %v1746_v15, %v1635_v16  ;;  %v1958_v18 = vpop.f32.mrb[33].mxu1 }
0x18e4   :  { %v1638_v19 = vpop.f32.mrb[34].mxu1 }
0x18e5   :  { %1641 = vst [vmem:[%s2586_s20] sm:$0x3] %v1636_v17  ;;  %v1959_v31 = vpop.f32.mrb[35].mxu1 }

</bundles_post_ra>
